<compile_context>
chip_gen: v6e
topology: v6e:2x2x1
jax: 0.10.0
libtpu: 0.0.40
codegen_flags: <defaults>
</compile_context>

<pallas_src>
import functools
import math

import jax
import jax.numpy as jnp
from jax.experimental import pallas as pl
from jax.experimental.pallas import tpu as pltpu


def _round_up(x, m):
    return ((x + m - 1) // m) * m


def _choose_block(n):
    """Largest tile in {512, 256, 128} whose row padding overhead is <= ~12.5%."""
    n_min = _round_up(n, 128)
    for blk in (512, 256, 128):
        n_pad = _round_up(n, blk)
        if n_pad * 8 <= n_min * 9:
            return blk, n_pad
    return 128, n_min


# ---------------------------------------------------------------------------
# Kernel 1 (fused GCN layer):  OUT = relu((A_hat @ X) @ W + b)
#   grid = (row tiles, k tiles); f32 accumulator over k; W/bias resident;
#   X either fully VMEM-resident (sliced in-kernel) or streamed per k tile.
# ---------------------------------------------------------------------------
def _gcn_layer_kernel(a_ref, x_ref, w_ref, b_ref, out_ref, acc_ref,
                      *, block, x_resident):
    k = pl.program_id(1)

    @pl.when(k == 0)
    def _():
        acc_ref[...] = jnp.zeros_like(acc_ref)

    if x_resident:
        start = pl.multiple_of(k * block, block)
        x_tile = x_ref[pl.ds(start, block), :]
    else:
        x_tile = x_ref[...]

    acc_ref[...] += jnp.dot(a_ref[...], x_tile,
                            preferred_element_type=jnp.float32)

    @pl.when(k == pl.num_programs(1) - 1)
    def _():
        h = jnp.dot(acc_ref[...].astype(w_ref.dtype), w_ref[...],
                    preferred_element_type=jnp.float32)
        out_ref[...] = jnp.maximum(h + b_ref[...], 0.0).astype(out_ref.dtype)


# ---------------------------------------------------------------------------
# Kernel 2: global_add_pool + MLP head, lane-dense (G_pad, 128) output.
#   grid = (k tiles over nodes); pooled accumulates in f32; head runs on the
#   last grid step.  Final Linear padded to 128 output lanes (column 0 real).
# ---------------------------------------------------------------------------
def _pool_head_kernel(p_ref, x_ref, w1_ref, b1_ref, w2_ref, b2_ref,
                      w3_ref, b3_ref, out_ref, acc_ref):
    k = pl.program_id(0)

    @pl.when(k == 0)
    def _():
        acc_ref[...] = jnp.zeros_like(acc_ref)

    acc_ref[...] += jnp.dot(
        p_ref[...], x_ref[...], preferred_element_type=jnp.float32)

    @pl.when(k == pl.num_programs(0) - 1)
    def _():
        cdt = w1_ref.dtype
        pooled = acc_ref[...].astype(cdt)
        h = jnp.dot(pooled, w1_ref[...], preferred_element_type=jnp.float32)
        h = jnp.maximum(h + b1_ref[...], 0.0).astype(cdt)
        h = jnp.dot(h, w2_ref[...], preferred_element_type=jnp.float32)
        h = jnp.maximum(h + b2_ref[...], 0.0).astype(cdt)
        logits = jnp.dot(h, w3_ref[...], preferred_element_type=jnp.float32)
        out_ref[...] = jax.nn.sigmoid(logits + b3_ref[...]).astype(out_ref.dtype)


# ---------------------------------------------------------------------------
# pallas_call wrappers
# ---------------------------------------------------------------------------
def _gcn_layer(a_p, x_p, w_p, b_p, *, block, x_resident, compute_dtype,
               vmem_limit_bytes):
    n_pad, d_pad = x_p.shape
    isz = jnp.dtype(compute_dtype).itemsize

    if x_resident:
        # One DMA of the full X per layer (constant block index -> no re-fetch).
        x_spec = pl.BlockSpec((n_pad, d_pad), lambda i, k: (0, 0))
        x_bytes = n_pad * d_pad * isz
    else:
        # Streamed path (large graphs): re-read factor is n_pad/block (small
        # at block=512), instead of n_pad/128 in the old kernel.
        x_spec = pl.BlockSpec((block, d_pad), lambda i, k: (k, 0))
        x_bytes = (n_pad // block) * n_pad * d_pad * isz

    kernel = functools.partial(_gcn_layer_kernel, block=block,
                               x_resident=x_resident)

    return pl.pallas_call(
        kernel,
        out_shape=jax.ShapeDtypeStruct((n_pad, d_pad), compute_dtype),
        grid_spec=pltpu.PrefetchScalarGridSpec(
            num_scalar_prefetch=0,
            grid=(n_pad // block, n_pad // block),
            in_specs=[pl.BlockSpec((block, block), lambda i, k: (i, k)),
                      x_spec,
                      pl.BlockSpec((d_pad, d_pad), lambda i, k: (0, 0)),
                      pl.BlockSpec((1, d_pad), lambda i, k: (0, 0))],
            out_specs=pl.BlockSpec((block, d_pad), lambda i, k: (i, 0)),
            scratch_shapes=[pltpu.VMEM((block, d_pad), jnp.float32)],
        ),
        compiler_params=pltpu.CompilerParams(
            dimension_semantics=("parallel", "arbitrary"),
            vmem_limit_bytes=vmem_limit_bytes),
        cost_estimate=pl.CostEstimate(
            flops=2 * n_pad * n_pad * d_pad + 2 * n_pad * d_pad * d_pad,
            transcendentals=0,
            bytes_accessed=(n_pad * n_pad * isz + x_bytes
                            + d_pad * d_pad * isz + n_pad * d_pad * isz)),
    )(a_p, x_p, w_p, b_p)


def _pool_head(p_p, x_p, w1_p, b1_p, w2_p, b2_p, w3_p, b3_p, *,
               block_k, compute_dtype, vmem_limit_bytes):
    g_pad, n_pad = p_p.shape
    d_pad = x_p.shape[1]
    out_lanes = w3_p.shape[1]
    isz = jnp.dtype(compute_dtype).itemsize

    return pl.pallas_call(
        _pool_head_kernel,
        out_shape=jax.ShapeDtypeStruct((g_pad, out_lanes), jnp.float32),
        grid_spec=pltpu.PrefetchScalarGridSpec(
            num_scalar_prefetch=0,
            grid=(n_pad // block_k,),
            in_specs=[pl.BlockSpec((g_pad, block_k), lambda k: (0, k)),
                      pl.BlockSpec((block_k, d_pad), lambda k: (k, 0)),
                      pl.BlockSpec((d_pad, d_pad), lambda k: (0, 0)),
                      pl.BlockSpec((1, d_pad), lambda k: (0, 0)),
                      pl.BlockSpec((d_pad, d_pad), lambda k: (0, 0)),
                      pl.BlockSpec((1, d_pad), lambda k: (0, 0)),
                      pl.BlockSpec((d_pad, out_lanes), lambda k: (0, 0)),
                      pl.BlockSpec((1, out_lanes), lambda k: (0, 0))],
            out_specs=pl.BlockSpec((g_pad, out_lanes), lambda k: (0, 0)),
            scratch_shapes=[pltpu.VMEM((g_pad, d_pad), jnp.float32)],
        ),
        compiler_params=pltpu.CompilerParams(
            dimension_semantics=("arbitrary",),
            vmem_limit_bytes=vmem_limit_bytes),
        cost_estimate=pl.CostEstimate(
            flops=2 * g_pad * (n_pad * d_pad + 2 * d_pad * d_pad
                               + d_pad * out_lanes),
            transcendentals=g_pad * out_lanes,
            bytes_accessed=(g_pad * n_pad + n_pad * d_pad + 2 * d_pad * d_pad
                            + d_pad * out_lanes + g_pad * out_lanes) * isz),
    )(p_p, x_p, w1_p, b1_p, w2_p, b2_p, w3_p, b3_p)


@functools.partial(jax.jit, static_argnames=("compute_dtype", "vmem_limit_bytes"))
def gnn_forward_pallas(a_hat, x, wc, bc, pool, w1, b1, w2, b2, w3, b3,
                       compute_dtype=jnp.bfloat16,
                       vmem_limit_bytes=48 * 1024 * 1024):
    """Full GNN forward: L x GCNConv(+ReLU) -> global_add_pool -> MLP -> sigmoid."""
    n, d = x.shape
    num_layers = wc.shape[0]
    g = pool.shape[0]

    block, n_pad = _choose_block(n)          # 512/256/128, padding-overhead aware
    d_pad = _round_up(d, 128)
    g_pad = _round_up(g, 8)
    out_lanes = 128  # lane-dense head output; real logit lives in column 0.

    isz = jnp.dtype(compute_dtype).itemsize
    # Keep X VMEM-resident (no per-row-tile re-stream) whenever it fits a
    # conservative slice of the VMEM budget (v7x: 64 MiB physical, cap 48 MiB).
    x_resident = (n_pad * d_pad * isz) <= vmem_limit_bytes // 4

    # Larger node tile for the pool/head kernel to amortize per-step overhead.
    pool_blk = block
    for mult in (8, 4, 2):
        if block * mult <= 1024 and n_pad % (block * mult) == 0:
            pool_blk = block * mult
            break

    def pad_to(arr, shape):
        return jnp.pad(arr, [(0, s - a) for s, a in zip(shape, arr.shape)])

    # Pad to MXU/vreg-friendly shapes; zero padding is semantics-preserving
    # (padded nodes never reach real nodes via A_hat / pool, padded channels
    # stay zero through zero-padded weights & biases).
    a_p = pad_to(a_hat, (n_pad, n_pad)).astype(compute_dtype)
    x_p = pad_to(x, (n_pad, d_pad)).astype(compute_dtype)
    wc_p = pad_to(wc, (num_layers, d_pad, d_pad)).astype(compute_dtype)
    bc_p = pad_to(bc, (num_layers, d_pad)).astype(jnp.float32)
    p_p = pad_to(pool, (g_pad, n_pad)).astype(compute_dtype)
    w1_p = pad_to(w1, (d_pad, d_pad)).astype(compute_dtype)
    b1_p = pad_to(b1, (1, d_pad)).astype(jnp.float32)
    w2_p = pad_to(w2, (d_pad, d_pad)).astype(compute_dtype)
    b2_p = pad_to(b2, (1, d_pad)).astype(jnp.float32)
    w3_p = pad_to(w3, (d_pad, out_lanes)).astype(compute_dtype)
    b3_p = pad_to(b3, (1, out_lanes)).astype(jnp.float32)

    h = x_p
    for l in range(num_layers):
        h = _gcn_layer(a_p, h, wc_p[l], bc_p[l][None, :],
                       block=block, x_resident=x_resident,
                       compute_dtype=compute_dtype,
                       vmem_limit_bytes=vmem_limit_bytes)

    out_padded = _pool_head(p_p, h, w1_p, b1_p, w2_p, b2_p, w3_p, b3_p,
                            block_k=pool_blk, compute_dtype=compute_dtype,
                            vmem_limit_bytes=vmem_limit_bytes)
    return out_padded[:g, :1]


# ---------------------------------------------------------------------------
# JAX glue: graph preprocessing + parameter init + pure-JAX reference.
# ---------------------------------------------------------------------------
def build_normalized_adjacency(edge_index, num_nodes):
    """Dense D^{-1/2}(A+I)D^{-1/2} matching torch_geometric GCNConv defaults:
    scatter-add counts duplicate edges; self-loops only added where missing."""
    src, dst = edge_index[0], edge_index[1]
    adj = jnp.zeros((num_nodes, num_nodes), jnp.float32)
    adj = adj.at[dst, src].add(1.0)                         # out[dst] += x[src]
    diag = jnp.diag(adj)
    adj = adj + jnp.diag(jnp.where(diag > 0.0, 0.0, 1.0))   # add *remaining* self-loops
    deg = adj.sum(axis=1)
    dinv = jnp.where(deg > 0.0, jax.lax.rsqrt(deg), 0.0)
    return adj * dinv[:, None] * dinv[None, :]


def build_pool_matrix(batch, num_graphs):
    """(G, N) one-hot sum matrix for global_add_pool."""
    return jax.nn.one_hot(batch, num_graphs, dtype=jnp.float32).T


def init_params(key, input_dim, num_layers):
    ks = jax.random.split(key, 4 + num_layers)
    scale = 1.0 / jnp.sqrt(jnp.float32(input_dim))
    wc = jnp.stack([jax.random.normal(ks[i], (input_dim, input_dim), jnp.float32) * scale
                    for i in range(num_layers)])              # (L, D, D)
    bc = jnp.zeros((num_layers, input_dim), jnp.float32)      # (L, D)
    w1 = jax.random.normal(ks[num_layers + 0], (input_dim, input_dim), jnp.float32) * scale
    b1 = jnp.zeros((1, input_dim), jnp.float32)
    w2 = jax.random.normal(ks[num_layers + 1], (input_dim, input_dim), jnp.float32) * scale
    b2 = jnp.zeros((1, input_dim), jnp.float32)
    w3 = jax.random.normal(ks[num_layers + 2], (input_dim, 1), jnp.float32) * scale
    b3 = jnp.zeros((1, 1), jnp.float32)
    return wc, bc, w1, b1, w2, b2, w3, b3


def reference_forward(a_hat, x, wc, bc, pool, w1, b1, w2, b2, w3, b3):
    h = x
    for l in range(wc.shape[0]):
        h = jax.nn.relu(a_hat @ (h @ wc[l]) + bc[l][None, :])
    pooled = pool @ h
    h = jax.nn.relu(pooled @ w1 + b1)
    h = jax.nn.relu(h @ w2 + b2)
    return jax.nn.sigmoid(h @ w3 + b3)


if __name__ == "__main__":
    key = jax.random.PRNGKey(0)
    k_x, k_e, k_p = jax.random.split(key, 3)

    # Small synthetic graph batch: 200 nodes, 4 graphs, feature dim 32, 2 GCN layers.
    num_nodes, input_dim, num_layers, num_graphs, num_edges = 200, 32, 2, 4, 600

    x = jax.random.normal(k_x, (num_nodes, input_dim), jnp.float32)
    edge_index = jax.random.randint(k_e, (2, num_edges), 0, num_nodes, dtype=jnp.int32)
    batch = jnp.repeat(jnp.arange(num_graphs, dtype=jnp.int32),
                       num_nodes // num_graphs)

    a_hat = build_normalized_adjacency(edge_index, num_nodes)
    pool = build_pool_matrix(batch, num_graphs)
    wc, bc, w1, b1, w2, b2, w3, b3 = init_params(k_p, input_dim, num_layers)

    ref = reference_forward(a_hat, x, wc, bc, pool, w1, b1, w2, b2, w3, b3)

    # f32 path: strict semantic check (tolerance covers the (A@X)@W vs A@(X@W)
    # reassociation of the fused layer kernel).
    out_f32 = gnn_forward_pallas(a_hat, x, wc, bc, pool, w1, b1, w2, b2, w3, b3,
                                 compute_dtype=jnp.float32)
    out_f32 = jax.block_until_ready(out_f32)
    assert out_f32.shape == (num_graphs, 1)
    assert jnp.allclose(out_f32, ref, atol=5e-4, rtol=5e-4), \
        f"f32 mismatch: {jnp.max(jnp.abs(out_f32 - ref))}"

    # bf16-MXU fast path (v6e/v7x recommendation): f32 accumulation, loose check.
    out_bf16 = gnn_forward_pallas(a_hat, x, wc, bc, pool, w1, b1, w2, b2, w3, b3,
                                  compute_dtype=jnp.bfloat16)
    out_bf16 = jax.block_until_ready(out_bf16)
    assert out_bf16.shape == (num_graphs, 1)
    assert jnp.max(jnp.abs(out_bf16 - ref)) < 1e-1, \
        f"bf16 mismatch: {jnp.max(jnp.abs(out_bf16 - ref))}"

    print("KERNEL_OK")
</pallas_src>

<mosaic_0001>
module attributes {stable_mosaic.version = 11 : i64} {
  func.func @_gcn_layer_kernel(%arg0: i32, %arg1: i32, %arg2: memref<256x256xf32, #tpu.memory_space<vmem>>, %arg3: memref<256x128xf32, #tpu.memory_space<vmem>>, %arg4: memref<128x128xf32, #tpu.memory_space<vmem>>, %arg5: memref<1x128xf32, #tpu.memory_space<vmem>>, %arg6: memref<256x128xf32, #tpu.memory_space<vmem>>, %arg7: memref<256x128xf32, #tpu.memory_space<vmem>>) attributes {dimension_semantics = [#tpu.dimension_semantics<parallel>, #tpu.dimension_semantics<arbitrary>], iteration_bounds = array<i64: 1, 1>, scalar_prefetch = 0 : i64, scratch_operands = 1 : i64, tpu.core_type = #tpu.core_type<tc>, window_params = [{transform_indices = @transform_0, window_bounds = array<i64: 256, 256>}, {pipeline_mode = #tpu.pipeline_mode<synchronous>, transform_indices = @transform_1, window_bounds = array<i64: 256, 128>}, {pipeline_mode = #tpu.pipeline_mode<synchronous>, transform_indices = @transform_2, window_bounds = array<i64: 128, 128>}, {pipeline_mode = #tpu.pipeline_mode<synchronous>, transform_indices = @transform_3, window_bounds = array<i64: 1, 128>}, {transform_indices = @transform_4, window_bounds = array<i64: 256, 128>}]} {
    %c0_i32 = arith.constant 0 : i32
    %0 = arith.cmpi eq, %arg1, %c0_i32 : i32
    %1 = arith.extui %0 : i1 to i32
    %c0_i32_0 = arith.constant 0 : i32
    %2 = arith.cmpi ne, %1, %c0_i32_0 : i32
    scf.if %2 {
      %cst_9 = arith.constant 0.000000e+00 : f32
      %15 = vector.broadcast %cst_9 : f32 to vector<256x128xf32>
      %c0_10 = arith.constant 0 : index
      %c0_11 = arith.constant 0 : index
      %16 = vector.load %arg7[%c0_10, %c0_11] : memref<256x128xf32, #tpu.memory_space<vmem>>, vector<256x128xf32>
      tpu.vector_store %arg7[%c0_10, %c0_11], %15 {strides = array<i32>} : memref<256x128xf32, #tpu.memory_space<vmem>>, vector<256x128xf32>,
    } else {
    }
    %c256_i32 = arith.constant 256 : i32
    %3 = arith.muli %arg1, %c256_i32 : i32
    %4 = tpu.assume_multiple %3, 256 : i32
    %5 = arith.index_cast %4 : i32 to index
    %c0 = arith.constant 0 : index
    %6 = vector.load %arg3[%5, %c0] : memref<256x128xf32, #tpu.memory_space<vmem>>, vector<256x128xf32>
    %c0_1 = arith.constant 0 : index
    %c0_2 = arith.constant 0 : index
    %7 = vector.load %arg7[%c0_1, %c0_2] : memref<256x128xf32, #tpu.memory_space<vmem>>, vector<256x128xf32>
    %c0_3 = arith.constant 0 : index
    %c0_4 = arith.constant 0 : index
    %8 = vector.load %arg2[%c0_3, %c0_4] : memref<256x256xf32, #tpu.memory_space<vmem>>, vector<256x256xf32>
    %cst = arith.constant dense<0.000000e+00> : vector<256x128xf32>
    %9 = tpu.matmul %8, %6, %cst {dimension_numbers = #tpu.dot_dimension_numbers<[1], [0], [0], [1], [0, 0, 1, 1], [], []>} : vector<256x256xf32>, vector<256x128xf32>, vector<256x128xf32> -> vector<256x128xf32>
    %10 = arith.addf %7, %9 : vector<256x128xf32>
    %c0_5 = arith.constant 0 : index
    %c0_6 = arith.constant 0 : index
    %11 = vector.load %arg7[%c0_5, %c0_6] : memref<256x128xf32, #tpu.memory_space<vmem>>, vector<256x128xf32>
    tpu.vector_store %arg7[%c0_5, %c0_6], %10 {strides = array<i32>} : memref<256x128xf32, #tpu.memory_space<vmem>>, vector<256x128xf32>,
    %c0_i32_7 = arith.constant 0 : i32
    %12 = arith.cmpi eq, %arg1, %c0_i32_7 : i32
    %13 = arith.extui %12 : i1 to i32
    %c0_i32_8 = arith.constant 0 : i32
    %14 = arith.cmpi ne, %13, %c0_i32_8 : i32
    scf.if %14 {
      %c0_9 = arith.constant 0 : index
      %c0_10 = arith.constant 0 : index
      %15 = vector.load %arg7[%c0_9, %c0_10] : memref<256x128xf32, #tpu.memory_space<vmem>>, vector<256x128xf32>
      %c0_11 = arith.constant 0 : index
      %c0_12 = arith.constant 0 : index
      %16 = vector.load %arg4[%c0_11, %c0_12] : memref<128x128xf32, #tpu.memory_space<vmem>>, vector<128x128xf32>
      %cst_13 = arith.constant dense<0.000000e+00> : vector<256x128xf32>
      %17 = tpu.matmul %15, %16, %cst_13 {dimension_numbers = #tpu.dot_dimension_numbers<[1], [0], [0], [1], [0, 0, 1, 1], [], []>} : vector<256x128xf32>, vector<128x128xf32>, vector<256x128xf32> -> vector<256x128xf32>
      %c0_14 = arith.constant 0 : index
      %c0_15 = arith.constant 0 : index
      %18 = vector.load %arg5[%c0_14, %c0_15] : memref<1x128xf32, #tpu.memory_space<vmem>>, vector<1x128xf32>
      %19 = vector.broadcast %18 : vector<1x128xf32> to vector<256x128xf32>
      %20 = arith.addf %17, %19 : vector<256x128xf32>
      %cst_16 = arith.constant 0.000000e+00 : f32
      %21 = vector.broadcast %cst_16 : f32 to vector<256x128xf32>
      %22 = arith.maximumf %20, %21 : vector<256x128xf32>
      %c0_17 = arith.constant 0 : index
      %c0_18 = arith.constant 0 : index
      %23 = vector.load %arg6[%c0_17, %c0_18] : memref<256x128xf32, #tpu.memory_space<vmem>>, vector<256x128xf32>
      tpu.vector_store %arg6[%c0_17, %c0_18], %22 {strides = array<i32>} : memref<256x128xf32, #tpu.memory_space<vmem>>, vector<256x128xf32>,
    } else {
    }
    return
  }
  func.func @transform_0(%arg0: i32, %arg1: i32) -> (i32, i32) {
    %c0_i32 = arith.constant 0 : i32
    return %arg0, %arg1 : i32, i32
  }
  func.func @transform_1(%arg0: i32, %arg1: i32) -> (i32, i32) {
    %c0_i32 = arith.constant 0 : i32
    %c0_i32_0 = arith.constant 0 : i32
    %c0_i32_1 = arith.constant 0 : i32
    return %c0_i32, %c0_i32_0 : i32, i32
  }
  func.func @transform_2(%arg0: i32, %arg1: i32) -> (i32, i32) {
    %c0_i32 = arith.constant 0 : i32
    %c0_i32_0 = arith.constant 0 : i32
    %c0_i32_1 = arith.constant 0 : i32
    return %c0_i32, %c0_i32_0 : i32, i32
  }
  func.func @transform_3(%arg0: i32, %arg1: i32) -> (i32, i32) {
    %c0_i32 = arith.constant 0 : i32
    %c0_i32_0 = arith.constant 0 : i32
    %c0_i32_1 = arith.constant 0 : i32
    return %c0_i32, %c0_i32_0 : i32, i32
  }
  func.func @transform_4(%arg0: i32, %arg1: i32) -> (i32, i32) {
    %c0_i32 = arith.constant 0 : i32
    %c0_i32_0 = arith.constant 0 : i32
    return %arg0, %c0_i32 : i32, i32
  }
}

module attributes {stable_mosaic.version = 11 : i64} {
  func.func @_pool_head_kernel(%arg0: i32, %arg1: memref<8x256xf32, #tpu.memory_space<vmem>>, %arg2: memref<256x128xf32, #tpu.memory_space<vmem>>, %arg3: memref<128x128xf32, #tpu.memory_space<vmem>>, %arg4: memref<1x128xf32, #tpu.memory_space<vmem>>, %arg5: memref<128x128xf32, #tpu.memory_space<vmem>>, %arg6: memref<1x128xf32, #tpu.memory_space<vmem>>, %arg7: memref<128x128xf32, #tpu.memory_space<vmem>>, %arg8: memref<1x128xf32, #tpu.memory_space<vmem>>, %arg9: memref<8x128xf32, #tpu.memory_space<vmem>>, %arg10: memref<8x128xf32, #tpu.memory_space<vmem>>) attributes {dimension_semantics = [#tpu.dimension_semantics<arbitrary>], iteration_bounds = array<i64: 1>, scalar_prefetch = 0 : i64, scratch_operands = 1 : i64, tpu.core_type = #tpu.core_type<tc>, window_params = [{transform_indices = @transform_0, window_bounds = array<i64: 8, 256>}, {transform_indices = @transform_1, window_bounds = array<i64: 256, 128>}, {pipeline_mode = #tpu.pipeline_mode<synchronous>, transform_indices = @transform_2, window_bounds = array<i64: 128, 128>}, {pipeline_mode = #tpu.pipeline_mode<synchronous>, transform_indices = @transform_3, window_bounds = array<i64: 1, 128>}, {pipeline_mode = #tpu.pipeline_mode<synchronous>, transform_indices = @transform_4, window_bounds = array<i64: 128, 128>}, {pipeline_mode = #tpu.pipeline_mode<synchronous>, transform_indices = @transform_5, window_bounds = array<i64: 1, 128>}, {pipeline_mode = #tpu.pipeline_mode<synchronous>, transform_indices = @transform_6, window_bounds = array<i64: 128, 128>}, {pipeline_mode = #tpu.pipeline_mode<synchronous>, transform_indices = @transform_7, window_bounds = array<i64: 1, 128>}, {pipeline_mode = #tpu.pipeline_mode<synchronous>, transform_indices = @transform_8, window_bounds = array<i64: 8, 128>}]} {
    %c0_i32 = arith.constant 0 : i32
    %0 = arith.cmpi eq, %arg0, %c0_i32 : i32
    %1 = arith.extui %0 : i1 to i32
    %c0_i32_0 = arith.constant 0 : i32
    %2 = arith.cmpi ne, %1, %c0_i32_0 : i32
    scf.if %2 {
      %cst_10 = arith.constant 0.000000e+00 : f32
      %12 = vector.broadcast %cst_10 : f32 to vector<8x128xf32>
      %c0_11 = arith.constant 0 : index
      %c0_12 = arith.constant 0 : index
      %13 = vector.load %arg10[%c0_11, %c0_12] : memref<8x128xf32, #tpu.memory_space<vmem>>, vector<8x128xf32>
      tpu.vector_store %arg10[%c0_11, %c0_12], %12 {strides = array<i32>} : memref<8x128xf32, #tpu.memory_space<vmem>>, vector<8x128xf32>,
    } else {
    }
    %c0 = arith.constant 0 : index
    %c0_1 = arith.constant 0 : index
    %3 = vector.load %arg10[%c0, %c0_1] : memref<8x128xf32, #tpu.memory_space<vmem>>, vector<8x128xf32>
    %c0_2 = arith.constant 0 : index
    %c0_3 = arith.constant 0 : index
    %4 = vector.load %arg1[%c0_2, %c0_3] : memref<8x256xf32, #tpu.memory_space<vmem>>, vector<8x256xf32>
    %c0_4 = arith.constant 0 : index
    %c0_5 = arith.constant 0 : index
    %5 = vector.load %arg2[%c0_4, %c0_5] : memref<256x128xf32, #tpu.memory_space<vmem>>, vector<256x128xf32>
    %cst = arith.constant dense<0.000000e+00> : vector<8x128xf32>
    %6 = tpu.matmul %4, %5, %cst {dimension_numbers = #tpu.dot_dimension_numbers<[1], [0], [0], [1], [0, 0, 1, 1], [], []>} : vector<8x256xf32>, vector<256x128xf32>, vector<8x128xf32> -> vector<8x128xf32>
    %7 = arith.addf %3, %6 : vector<8x128xf32>
    %c0_6 = arith.constant 0 : index
    %c0_7 = arith.constant 0 : index
    %8 = vector.load %arg10[%c0_6, %c0_7] : memref<8x128xf32, #tpu.memory_space<vmem>>, vector<8x128xf32>
    tpu.vector_store %arg10[%c0_6, %c0_7], %7 {strides = array<i32>} : memref<8x128xf32, #tpu.memory_space<vmem>>, vector<8x128xf32>,
    %c0_i32_8 = arith.constant 0 : i32
    %9 = arith.cmpi eq, %arg0, %c0_i32_8 : i32
    %10 = arith.extui %9 : i1 to i32
    %c0_i32_9 = arith.constant 0 : i32
    %11 = arith.cmpi ne, %10, %c0_i32_9 : i32
    scf.if %11 {
      %c0_10 = arith.constant 0 : index
      %c0_11 = arith.constant 0 : index
      %12 = vector.load %arg10[%c0_10, %c0_11] : memref<8x128xf32, #tpu.memory_space<vmem>>, vector<8x128xf32>
      %c0_12 = arith.constant 0 : index
      %c0_13 = arith.constant 0 : index
      %13 = vector.load %arg3[%c0_12, %c0_13] : memref<128x128xf32, #tpu.memory_space<vmem>>, vector<128x128xf32>
      %cst_14 = arith.constant dense<0.000000e+00> : vector<8x128xf32>
      %14 = tpu.matmul %12, %13, %cst_14 {dimension_numbers = #tpu.dot_dimension_numbers<[1], [0], [0], [1], [0, 0, 1, 1], [], []>} : vector<8x128xf32>, vector<128x128xf32>, vector<8x128xf32> -> vector<8x128xf32>
      %c0_15 = arith.constant 0 : index
      %c0_16 = arith.constant 0 : index
      %15 = vector.load %arg4[%c0_15, %c0_16] : memref<1x128xf32, #tpu.memory_space<vmem>>, vector<1x128xf32>
      %16 = vector.broadcast %15 : vector<1x128xf32> to vector<8x128xf32>
      %17 = arith.addf %14, %16 : vector<8x128xf32>
      %cst_17 = arith.constant 0.000000e+00 : f32
      %18 = vector.broadcast %cst_17 : f32 to vector<8x128xf32>
      %19 = arith.maximumf %17, %18 : vector<8x128xf32>
      %c0_18 = arith.constant 0 : index
      %c0_19 = arith.constant 0 : index
      %20 = vector.load %arg5[%c0_18, %c0_19] : memref<128x128xf32, #tpu.memory_space<vmem>>, vector<128x128xf32>
      %cst_20 = arith.constant dense<0.000000e+00> : vector<8x128xf32>
      %21 = tpu.matmul %19, %20, %cst_20 {dimension_numbers = #tpu.dot_dimension_numbers<[1], [0], [0], [1], [0, 0, 1, 1], [], []>} : vector<8x128xf32>, vector<128x128xf32>, vector<8x128xf32> -> vector<8x128xf32>
      %c0_21 = arith.constant 0 : index
      %c0_22 = arith.constant 0 : index
      %22 = vector.load %arg6[%c0_21, %c0_22] : memref<1x128xf32, #tpu.memory_space<vmem>>, vector<1x128xf32>
      %23 = vector.broadcast %22 : vector<1x128xf32> to vector<8x128xf32>
      %24 = arith.addf %21, %23 : vector<8x128xf32>
      %cst_23 = arith.constant 0.000000e+00 : f32
      %25 = vector.broadcast %cst_23 : f32 to vector<8x128xf32>
      %26 = arith.maximumf %24, %25 : vector<8x128xf32>
      %c0_24 = arith.constant 0 : index
      %c0_25 = arith.constant 0 : index
      %27 = vector.load %arg7[%c0_24, %c0_25] : memref<128x128xf32, #tpu.memory_space<vmem>>, vector<128x128xf32>
      %cst_26 = arith.constant dense<0.000000e+00> : vector<8x128xf32>
      %28 = tpu.matmul %26, %27, %cst_26 {dimension_numbers = #tpu.dot_dimension_numbers<[1], [0], [0], [1], [0, 0, 1, 1], [], []>} : vector<8x128xf32>, vector<128x128xf32>, vector<8x128xf32> -> vector<8x128xf32>
      %c0_27 = arith.constant 0 : index
      %c0_28 = arith.constant 0 : index
      %29 = vector.load %arg8[%c0_27, %c0_28] : memref<1x128xf32, #tpu.memory_space<vmem>>, vector<1x128xf32>
      %30 = vector.broadcast %29 : vector<1x128xf32> to vector<8x128xf32>
      %31 = arith.addf %28, %30 : vector<8x128xf32>
      %32 = arith.negf %31 : vector<8x128xf32>
      %33 = math.exp %32 : vector<8x128xf32>
      %cst_29 = arith.constant 1.000000e+00 : f32
      %34 = vector.broadcast %cst_29 : f32 to vector<8x128xf32>
      %35 = arith.addf %34, %33 : vector<8x128xf32>
      %36 = arith.divf %34, %35 : vector<8x128xf32>
      %c0_30 = arith.constant 0 : index
      %c0_31 = arith.constant 0 : index
      %37 = vector.load %arg9[%c0_30, %c0_31] : memref<8x128xf32, #tpu.memory_space<vmem>>, vector<8x128xf32>
      tpu.vector_store %arg9[%c0_30, %c0_31], %36 {strides = array<i32>} : memref<8x128xf32, #tpu.memory_space<vmem>>, vector<8x128xf32>,
    } else {
    }
    return
  }
  func.func @transform_0(%arg0: i32) -> (i32, i32) {
    %c0_i32 = arith.constant 0 : i32
    %c0_i32_0 = arith.constant 0 : i32
    return %c0_i32, %arg0 : i32, i32
  }
  func.func @transform_1(%arg0: i32) -> (i32, i32) {
    %c0_i32 = arith.constant 0 : i32
    %c0_i32_0 = arith.constant 0 : i32
    return %arg0, %c0_i32 : i32, i32
  }
  func.func @transform_2(%arg0: i32) -> (i32, i32) {
    %c0_i32 = arith.constant 0 : i32
    %c0_i32_0 = arith.constant 0 : i32
    %c0_i32_1 = arith.constant 0 : i32
    return %c0_i32, %c0_i32_0 : i32, i32
  }
  func.func @transform_3(%arg0: i32) -> (i32, i32) {
    %c0_i32 = arith.constant 0 : i32
    %c0_i32_0 = arith.constant 0 : i32
    %c0_i32_1 = arith.constant 0 : i32
    return %c0_i32, %c0_i32_0 : i32, i32
  }
  func.func @transform_4(%arg0: i32) -> (i32, i32) {
    %c0_i32 = arith.constant 0 : i32
    %c0_i32_0 = arith.constant 0 : i32
    %c0_i32_1 = arith.constant 0 : i32
    return %c0_i32, %c0_i32_0 : i32, i32
  }
  func.func @transform_5(%arg0: i32) -> (i32, i32) {
    %c0_i32 = arith.constant 0 : i32
    %c0_i32_0 = arith.constant 0 : i32
    %c0_i32_1 = arith.constant 0 : i32
    return %c0_i32, %c0_i32_0 : i32, i32
  }
  func.func @transform_6(%arg0: i32) -> (i32, i32) {
    %c0_i32 = arith.constant 0 : i32
    %c0_i32_0 = arith.constant 0 : i32
    %c0_i32_1 = arith.constant 0 : i32
    return %c0_i32, %c0_i32_0 : i32, i32
  }
  func.func @transform_7(%arg0: i32) -> (i32, i32) {
    %c0_i32 = arith.constant 0 : i32
    %c0_i32_0 = arith.constant 0 : i32
    %c0_i32_1 = arith.constant 0 : i32
    return %c0_i32, %c0_i32_0 : i32, i32
  }
  func.func @transform_8(%arg0: i32) -> (i32, i32) {
    %c0_i32 = arith.constant 0 : i32
    %c0_i32_0 = arith.constant 0 : i32
    %c0_i32_1 = arith.constant 0 : i32
    return %c0_i32, %c0_i32_0 : i32, i32
  }
}

</mosaic_0001>

<bundles_post_ra>
// kernel: gnn_forward_pallas.5
= control target key start
LH: loop header
LB: loop body
LE: loop exit
PB: predicated region body
PF: predicated region fallthrough
CT: control target
= control target key end

     0   :  { %v638_v3 = vmov 0.0   ;;  %vm639_vm0 = vmmov 0   ;;  %s997_s1 = inlined_call_operand.vmem [shape: f32[256,128], index: 1, kind: input, shape index: {}]   ;;  %s998_s0 = inlined_call_operand.vmem [shape: f32[8,256], index: 0, kind: input, shape index: {}]   ;;  %s999_s2 = inlined_call_operand.vmem [shape: f32[128,128], index: 2, kind: input, shape index: {}]   ;;  %s1000_s4 = inlined_call_operand.vmem [shape: f32[128,128], index: 4, kind: input, shape index: {}]   ;;  %s1001_s6 = inlined_call_operand.vmem [shape: f32[128,128], index: 6, kind: input, shape index: {}]   ;;  %s1002_s3 = inlined_call_operand.vmem [shape: f32[1,128], index: 3, kind: input, shape index: {}]   ;;  %s1003_s5 = inlined_call_operand.vmem [shape: f32[1,128], index: 5, kind: input, shape index: {}]   ;;  %s1004_s7 = inlined_call_operand.vmem [shape: f32[1,128], index: 7, kind: input, shape index: {}]   ;;  %s1005_s8 = inlined_call_operand.vmem [shape: f32[8,128], index: 8, kind: output, shape index: {}]  }
   0x1   :  { %v68_v0 = vld [vmem:[%s997_s1 + $0xf8] sm:$0xff]  ;;  %v67_v2 = vld [vmem:[%s997_s1 + $0xf0] sm:$0xff]  ;;  %527 = vmatprep.subr.mxu1 %v638_v3  ;;  %v66_v5 = vld [vmem:[%s997_s1 + $0xe8] sm:$0xff]  ;;  %559 = vmatprep.mubr.msk.f32.mxu1 %vm639_vm0, %v638_v3 }
   0x2   :  { %v52_v1 = vld [vmem:[%s997_s1 + $0x78] sm:$0xff]  ;;  %441 = vmatprep.subr.mxu0 %v68_v0  ;;  %v51_v4 = vld [vmem:[%s997_s1 + $0x70] sm:$0xff]  ;;  %v50_v6 = vld [vmem:[%s997_s1 + $0x68] sm:$0xff] }
   0x3   :  { %442 = vmatpush3.msra.mxu0 %v52_v1  ;;  %v65_v7 = vld [vmem:[%s997_s1 + $0xe0] sm:$0xff]  ;;  %v64_v9 = vld [vmem:[%s997_s1 + $0xd8] sm:$0xff]  ;;  %v63_v11 = vld [vmem:[%s997_s1 + $0xd0] sm:$0xff] }
   0x4   :  { %443 = vmatprep.subr.mxu0 %v67_v2  ;;  %v49_v8 = vld [vmem:[%s997_s1 + $0x60] sm:$0xff]  ;;  %v48_v10 = vld [vmem:[%s997_s1 + $0x58] sm:$0xff]  ;;  %v47_v12 = vld [vmem:[%s997_s1 + $0x50] sm:$0xff] }
   0x5   :  { %444 = vmatpush3.msra.mxu0 %v51_v4  ;;  %v62_v13 = vld [vmem:[%s997_s1 + $0xc8] sm:$0xff]  ;;  %v160_v16 = vld [vmem:[%s999_s2 + $0x78] sm:$0xff]  ;;  %v159_v17 = vld [vmem:[%s999_s2 + $0x70] sm:$0xff] }
   0x6   :  { %445 = vmatprep.subr.mxu0 %v66_v5  ;;  %v36_v14 = vld [vmem:[%s998_s0 + $0x8] sm:$0xff]  ;;  %v61_v18 = vld [vmem:[%s997_s1 + $0xc0] sm:$0xff]  ;;  %528 = vmatpush3.msra.mxu1 %v160_v16  ;;  %v60_v21 = vld [vmem:[%s997_s1 + $0xb8] sm:$0xff] }
   0x7   :  { %446 = vmatpush3.msra.mxu0 %v50_v6  ;;  %v46_v15 = vld [vmem:[%s997_s1 + $0x48] sm:$0xff]  ;;  %133 = vmatprep.mubr.f32.mxu0 %v36_v14  ;;  %v45_v19 = vld [vmem:[%s997_s1 + $0x40] sm:$0xff]  ;;  %v44_v22 = vld [vmem:[%s997_s1 + $0x38] sm:$0xff] }
   0x8   :  { %447 = vmatprep.subr.mxu0 %v65_v7  ;;  %529 = vmatprep.subr.mxu1 %v638_v3  ;;  %v158_v20 = vld [vmem:[%s999_s2 + $0x68] sm:$0xff]  ;;  %v157_v23 = vld [vmem:[%s999_s2 + $0x60] sm:$0xff]  ;;  %v59_v24 = vld [vmem:[%s997_s1 + $0xb0] sm:$0xff] }
   0x9   :  { %448 = vmatpush3.msra.mxu0 %v49_v8  ;;  %530 = vmatpush3.msra.mxu1 %v159_v17  ;;  %v43_v25 = vld [vmem:[%s997_s1 + $0x30] sm:$0xff]  ;;  %v156_v26 = vld [vmem:[%s999_s2 + $0x58] sm:$0xff]  ;;  %v58_v27 = vld [vmem:[%s997_s1 + $0xa8] sm:$0xff] }
   0xa   :  { %449 = vmatprep.subr.mxu0 %v64_v9  ;;  %531 = vmatprep.subr.mxu1 %v638_v3  ;;  %v42_v28 = vld [vmem:[%s997_s1 + $0x28] sm:$0xff]  ;;  %v155_v29 = vld [vmem:[%s999_s2 + $0x50] sm:$0xff]  ;;  %v57_v30 = vld [vmem:[%s997_s1 + $0xa0] sm:$0xff] }
   0xb   :  { %450 = vmatpush3.msra.mxu0 %v48_v10  ;;  %532 = vmatpush3.msra.mxu1 %v158_v20  ;;  %v41_v31 = vld [vmem:[%s997_s1 + $0x20] sm:$0xff]  ;;  %v154_v32 = vld [vmem:[%s999_s2 + $0x48] sm:$0xff]  ;;  %v56_v33 = vld [vmem:[%s997_s1 + $0x98] sm:$0xff] }
   0xc   :  { %451 = vmatprep.subr.mxu0 %v63_v11  ;;  %533 = vmatprep.subr.mxu1 %v638_v3  ;;  %v40_v34 = vld [vmem:[%s997_s1 + $0x18] sm:$0xff]  ;;  %v153_v35 = vld [vmem:[%s999_s2 + $0x40] sm:$0xff]  ;;  %v55_v36 = vld [vmem:[%s997_s1 + $0x90] sm:$0xff] }
   0xd   :  { %452 = vmatpush3.msra.mxu0 %v47_v12  ;;  %534 = vmatpush3.msra.mxu1 %v157_v23  ;;  %v39_v37 = vld [vmem:[%s997_s1 + $0x10] sm:$0xff]  ;;  %v152_v38 = vld [vmem:[%s999_s2 + $0x38] sm:$0xff]  ;;  %v54_v39 = vld [vmem:[%s997_s1 + $0x88] sm:$0xff] }
   0xe   :  { %453 = vmatprep.subr.mxu0 %v62_v13  ;;  %535 = vmatprep.subr.mxu1 %v638_v3  ;;  %v38_v40 = vld [vmem:[%s997_s1 + $0x8] sm:$0xff]  ;;  %v151_v41 = vld [vmem:[%s999_s2 + $0x30] sm:$0xff]  ;;  %v53_v42 = vld [vmem:[%s997_s1 + $0x80] sm:$0xff] }
   0xf   :  { %454 = vmatpush3.msra.mxu0 %v46_v15  ;;  %536 = vmatpush3.msra.mxu1 %v156_v26  ;;  %v37_v43 = vld [vmem:[%s997_s1] sm:$0xff]  ;;  %v150_v44 = vld [vmem:[%s999_s2 + $0x28] sm:$0xff]  ;;  %v148_v47 = vld [vmem:[%s999_s2 + $0x18] sm:$0xff] }
  0x10   :  { %455 = vmatprep.subr.mxu0 %v61_v18  ;;  %537 = vmatprep.subr.mxu1 %v638_v3  ;;  %v35_v45 = vld [vmem:[%s998_s0] sm:$0xff]  ;;  %v147_v48 = vld [vmem:[%s999_s2 + $0x10] sm:$0xff]  ;;  %v146_v49 = vld [vmem:[%s999_s2 + $0x8] sm:$0xff] }
  0x11   :  { %456 = vmatpush3.msra.mxu0 %v45_v19  ;;  %538 = vmatpush3.msra.mxu1 %v155_v29  ;;  %v149_v46 = vld [vmem:[%s999_s2 + $0x20] sm:$0xff]  ;;  %v254_v51 = vld [vmem:[%s1000_s4 + $0x78] sm:$0xff]  ;;  %v253_v52 = vld [vmem:[%s1000_s4 + $0x70] sm:$0xff] }
  0x12   :  { %457 = vmatprep.subr.mxu0 %v60_v21  ;;  %539 = vmatprep.subr.mxu1 %v638_v3  ;;  %v145_v50 = vld [vmem:[%s999_s2] sm:$0xff]  ;;  %v252_v53 = vld [vmem:[%s1000_s4 + $0x68] sm:$0xff]  ;;  %v250_v55 = vld [vmem:[%s1000_s4 + $0x58] sm:$0xff] }
  0x13   :  { %458 = vmatpush3.msra.mxu0 %v44_v22  ;;  %540 = vmatpush3.msra.mxu1 %v154_v32  ;;  %v251_v54 = vld [vmem:[%s1000_s4 + $0x60] sm:$0xff]  ;;  %v249_v56 = vld [vmem:[%s1000_s4 + $0x50] sm:$0xff]  ;;  %v248_v57 = vld [vmem:[%s1000_s4 + $0x48] sm:$0xff] }
  0x14   :  { %459 = vmatprep.subr.mxu0 %v59_v24  ;;  %541 = vmatprep.subr.mxu1 %v638_v3  ;;  %v247_v58 = vld [vmem:[%s1000_s4 + $0x40] sm:$0xff]  ;;  %v246_v59 = vld [vmem:[%s1000_s4 + $0x38] sm:$0xff]  ;;  %v245_v60 = vld [vmem:[%s1000_s4 + $0x30] sm:$0xff] }
  0x15   :  { %460 = vmatpush3.msra.mxu0 %v43_v25  ;;  %542 = vmatpush3.msra.mxu1 %v153_v35  ;;  %v244_v61 = vld [vmem:[%s1000_s4 + $0x28] sm:$0xff]  ;;  %v243_v62 = vld [vmem:[%s1000_s4 + $0x20] sm:$0xff]  ;;  %v242_v63 = vld [vmem:[%s1000_s4 + $0x18] sm:$0xff] }
  0x16   :  { %461 = vmatprep.subr.mxu0 %v58_v27  ;;  %543 = vmatprep.subr.mxu1 %v638_v3  ;;  %v241_v4 = vld [vmem:[%s1000_s4 + $0x10] sm:$0xff]  ;;  %v240_v5 = vld [vmem:[%s1000_s4 + $0x8] sm:$0xff]  ;;  %v239_v6 = vld [vmem:[%s1000_s4] sm:$0xff] }
  0x17   :  { %462 = vmatpush3.msra.mxu0 %v42_v28  ;;  %544 = vmatpush3.msra.mxu1 %v152_v38  ;;  %v348_v7 = vld [vmem:[%s1001_s6 + $0x78] sm:$0xff]  ;;  %v347_v8 = vld [vmem:[%s1001_s6 + $0x70] sm:$0xff]  ;;  %v346_v9 = vld [vmem:[%s1001_s6 + $0x68] sm:$0xff] }
  0x18   :  { %463 = vmatprep.subr.mxu0 %v57_v30  ;;  %545 = vmatprep.subr.mxu1 %v638_v3  ;;  %v345_v10 = vld [vmem:[%s1001_s6 + $0x60] sm:$0xff]  ;;  %v344_v11 = vld [vmem:[%s1001_s6 + $0x58] sm:$0xff]  ;;  %v343_v12 = vld [vmem:[%s1001_s6 + $0x50] sm:$0xff] }
  0x19   :  { %464 = vmatpush3.msra.mxu0 %v41_v31  ;;  %546 = vmatpush3.msra.mxu1 %v151_v41  ;;  %v342_v13 = vld [vmem:[%s1001_s6 + $0x48] sm:$0xff]  ;;  %v341_v14 = vld [vmem:[%s1001_s6 + $0x40] sm:$0xff]  ;;  %v340_v15 = vld [vmem:[%s1001_s6 + $0x38] sm:$0xff] }
  0x1a   :  { %465 = vmatprep.subr.mxu0 %v56_v33  ;;  %547 = vmatprep.subr.mxu1 %v638_v3  ;;  %v339_v16 = vld [vmem:[%s1001_s6 + $0x30] sm:$0xff]  ;;  %v338_v17 = vld [vmem:[%s1001_s6 + $0x28] sm:$0xff]  ;;  %v337_v18 = vld [vmem:[%s1001_s6 + $0x20] sm:$0xff] }
  0x1b   :  { %466 = vmatpush3.msra.mxu0 %v40_v34  ;;  %548 = vmatpush3.msra.mxu1 %v150_v44  ;;  %v336_v19 = vld [vmem:[%s1001_s6 + $0x18] sm:$0xff]  ;;  %v437_v20 = vld [vmem:[%s1002_s3] ss:$0 sm:$0xff]  ;;  %v335_v25 = vld [vmem:[%s1001_s6 + $0x10] sm:$0xff] }
  0x1c   :  { %467 = vmatprep.subr.mxu0 %v55_v36  ;;  %549 = vmatprep.subr.mxu1 %v638_v3  ;;  %v334_v26 = vld [vmem:[%s1001_s6 + $0x8] sm:$0xff]  ;;  %v333_v27 = vld [vmem:[%s1001_s6] sm:$0xff] }
  0x1d   :  { %468 = vmatpush3.msra.mxu0 %v39_v37  ;;  %550 = vmatpush3.msra.mxu1 %v149_v46  ;;  %v438_v28 = vld [vmem:[%s1003_s5] ss:$0 sm:$0xff] }
  0x1e   :  { %469 = vmatprep.subr.mxu0 %v54_v39  ;;  %551 = vmatprep.subr.mxu1 %v638_v3  ;;  %v439_v33 = vld [vmem:[%s1004_s7] ss:$0 sm:$0xff] }
  0x1f   :  { %470 = vmatpush3.msra.mxu0 %v38_v40  ;;  %552 = vmatpush3.msra.mxu1 %v148_v47 }
  0x20   :  { %471 = vmatprep.subr.mxu0 %v53_v42  ;;  %553 = vmatprep.subr.mxu1 %v638_v3 }
  0x21   :  { %472 = vmatpush3.msra.mxu0 %v37_v43  ;;  %554 = vmatpush3.msra.mxu1 %v147_v48 }
  0x22   :  { %134 = vmatmul.mubr.f32.vlgmr.msra.gmra.mxu0 %v35_v45  ;;  %562 = vmatprep.subr.mxu0 %v638_v3 }
  0x23   :  { %555 = vmatprep.subr.mxu1 %v638_v3  ;;  %594 = vmatprep.mubr.msk.f32.mxu0 %vm639_vm0, %v638_v3 }
  0x24   :  { %556 = vmatpush3.msra.mxu1 %v146_v49  ;;  %563 = vmatpush3.msra.mxu0 %v254_v51 }
  0x25   :  { %557 = vmatprep.subr.mxu1 %v638_v3  ;;  %564 = vmatprep.subr.mxu0 %v638_v3 }
  0x26   :  { %558 = vmatpush3.msra.mxu1 %v145_v50  ;;  %565 = vmatpush3.msra.mxu0 %v253_v52 }
  0x27   :  { %597 = vmatprep.subr.mxu1 %v638_v3  ;;  %566 = vmatprep.subr.mxu0 %v638_v3 }
  0x28   :  { %567 = vmatpush3.msra.mxu0 %v252_v53 }
  0x29   :  { %568 = vmatprep.subr.mxu0 %v638_v3 }
  0x2a   :  { %569 = vmatpush3.msra.mxu0 %v251_v54 }
  0x2b   :  { %570 = vmatprep.subr.mxu0 %v638_v3 }
  0x2c   :  { %571 = vmatpush3.msra.mxu0 %v250_v55 }
  0x2d   :  { %572 = vmatprep.subr.mxu0 %v638_v3 }
  0x2e   :  { %573 = vmatpush3.msra.mxu0 %v249_v56 }
  0x2f   :  { %574 = vmatprep.subr.mxu0 %v638_v3 }
  0x30   :  { %575 = vmatpush3.msra.mxu0 %v248_v57 }
  0x31   :  { %576 = vmatprep.subr.mxu0 %v638_v3 }
  0x32   :  { %577 = vmatpush3.msra.mxu0 %v247_v58 }
  0x33   :  { %578 = vmatprep.subr.mxu0 %v638_v3 }
  0x34   :  { %579 = vmatpush3.msra.mxu0 %v246_v59 }
  0x35   :  { %580 = vmatprep.subr.mxu0 %v638_v3 }
  0x36   :  { %581 = vmatpush3.msra.mxu0 %v245_v60 }
  0x37   :  { %582 = vmatprep.subr.mxu0 %v638_v3 }
  0x38   :  { %583 = vmatpush3.msra.mxu0 %v244_v61 }
  0x39   :  { %584 = vmatprep.subr.mxu0 %v638_v3 }
  0x3a   :  { %585 = vmatpush3.msra.mxu0 %v243_v62 }
  0x3b   :  { %586 = vmatprep.subr.mxu0 %v638_v3 }
  0x3c   :  { %587 = vmatpush3.msra.mxu0 %v242_v63 }
  0x3d   :  { %588 = vmatprep.subr.mxu0 %v638_v3 }
  0x3e   :  { %589 = vmatpush3.msra.mxu0 %v241_v4 }
  0x3f   :  { %590 = vmatprep.subr.mxu0 %v638_v3 }
  0x40   :  { %591 = vmatpush3.msra.mxu0 %v240_v5 }
  0x41   :  { %592 = vmatprep.subr.mxu0 %v638_v3 }
  0x42   :  { %593 = vmatpush3.msra.mxu0 %v239_v6 }
  0xe2   :  { %v473_v0 = vpop.f32.mrf.mxu0 }
  0xe4   :  { %v474_v1 = vpop.f32.mrf.mxu0 }
  0xe5   :  { %v475_v2 = vadd.f32 %v474_v1, %v473_v0 }
  0xe7   :  { %560 = vmatmul.mubr.f32.vlgmr.msra.gmra.mxu1 %v475_v2 }
  0xe8   :  { %629 = vmatprep.mubr.msk.f32.mxu1 %vm639_vm0, %v638_v3  ;;  %598 = vmatpush3.msra.mxu1 %v348_v7 }
  0xe9   :  { %599 = vmatprep.subr.mxu1 %v638_v3 }
  0xea   :  { %600 = vmatpush3.msra.mxu1 %v347_v8 }
  0xeb   :  { %601 = vmatprep.subr.mxu1 %v638_v3 }
  0xec   :  { %602 = vmatpush3.msra.mxu1 %v346_v9 }
  0xed   :  { %603 = vmatprep.subr.mxu1 %v638_v3 }
  0xee   :  { %604 = vmatpush3.msra.mxu1 %v345_v10 }
  0xef   :  { %605 = vmatprep.subr.mxu1 %v638_v3 }
  0xf0   :  { %606 = vmatpush3.msra.mxu1 %v344_v11 }
  0xf1   :  { %607 = vmatprep.subr.mxu1 %v638_v3 }
  0xf2   :  { %608 = vmatpush3.msra.mxu1 %v343_v12 }
  0xf3   :  { %609 = vmatprep.subr.mxu1 %v638_v3 }
  0xf4   :  { %610 = vmatpush3.msra.mxu1 %v342_v13 }
  0xf5   :  { %611 = vmatprep.subr.mxu1 %v638_v3 }
  0xf6   :  { %612 = vmatpush3.msra.mxu1 %v341_v14 }
  0xf7   :  { %613 = vmatprep.subr.mxu1 %v638_v3 }
  0xf8   :  { %614 = vmatpush3.msra.mxu1 %v340_v15 }
  0xf9   :  { %615 = vmatprep.subr.mxu1 %v638_v3 }
  0xfa   :  { %616 = vmatpush3.msra.mxu1 %v339_v16 }
  0xfb   :  { %617 = vmatprep.subr.mxu1 %v638_v3 }
  0xfc   :  { %618 = vmatpush3.msra.mxu1 %v338_v17 }
  0xfd   :  { %619 = vmatprep.subr.mxu1 %v638_v3 }
  0xfe   :  { %620 = vmatpush3.msra.mxu1 %v337_v18 }
  0xff   :  { %621 = vmatprep.subr.mxu1 %v638_v3 }
 0x100   :  { %622 = vmatpush3.msra.mxu1 %v336_v19 }
 0x101   :  { %623 = vmatprep.subr.mxu1 %v638_v3 }
 0x102   :  { %624 = vmatpush3.msra.mxu1 %v335_v25 }
 0x103   :  { %625 = vmatprep.subr.mxu1 %v638_v3 }
 0x104   :  { %626 = vmatpush3.msra.mxu1 %v334_v26 }
 0x105   :  { %627 = vmatprep.subr.mxu1 %v638_v3 }
 0x106   :  { %628 = vmatpush3.msra.mxu1 %v333_v27 }
 0x1a7   :  { %v234_v21 = vpop.f32.mrf.mxu1 }
 0x1a8   :  { %v235_v22 = vadd.f32 %v437_v20, %v234_v21 }
 0x1a9   :  { %v561_v23 = vpop.f32.mrf.mxu1 }
 0x1aa   :  { %v238_v24 = vmax.f32 %v235_v22, 0.0 }
 0x1ac   :  { %595 = vmatmul.mubr.f32.vlgmr.msra.gmra.mxu0 %v238_v24 }
 0x26c   :  { %v328_v29 = vpop.f32.mrf.mxu0 }
 0x26d   :  { %v329_v30 = vadd.f32 %v438_v28, %v328_v29 }
 0x26e   :  { %v596_v31 = vpop.f32.mrf.mxu0 }
 0x26f   :  { %v332_v32 = vmax.f32 %v329_v30, 0.0 }
 0x271   :  { %630 = vmatmul.mubr.f32.vlgmr.msra.gmra.mxu1 %v332_v32 }
 0x331   :  { %v422_v34 = vpop.f32.mrf.mxu1 }
 0x332   :  { %v423_v3 = vadd.f32 %v439_v33, %v422_v34 }
 0x333   :  { %v631_v35 = vpop.f32.mrf.mxu1 }
 0x334   :  { %v440_v36 = vmul.f32 -1.442695, %v423_v3 }
 0x336   :  { %634 = vpow2.f32 %v440_v36 }
 0x343   :  { %v635_v37 = vpop.eup %634 }
 0x344   :  { %v429_v38 = vadd.f32 1.0, %v635_v37 }
 0x346   :  { %636 = vrcp.f32 %v429_v38 }
 0x353   :  { %v637_v39 = vpop.eup %636 }
 0x354   :  { %432 = vst [vmem:[%s1005_s8] sm:$0xff] %v637_v39 }

// kernel: gnn_forward_pallas.3
= control target key start
LH: loop header
LB: loop body
LE: loop exit
PB: predicated region body
PF: predicated region fallthrough
CT: control target
= control target key end

     0   :  { %v1017_v0 = vmov 0.0   ;;  %s1594_s1 = inlined_call_operand.vmem [shape: f32[256,128], index: 1, kind: input, shape index: {}]   ;;  %s1595_s0 = inlined_call_operand.vmem [shape: f32[256,256], index: 0, kind: input, shape index: {}]   ;;  %s1596_s2 = inlined_call_operand.vmem [shape: f32[128,128], index: 2, kind: input, shape index: {}]   ;;  %s1597_s3 = inlined_call_operand.vmem [shape: f32[1,128], index: 3, kind: input, shape index: {}]   ;;  %s1598_s4 = inlined_call_operand.vmem [shape: f32[256,128], index: 4, kind: output, shape index: {}]  }
   0x1   :  { %183 = vmatprep.subr.mxu0 %v1017_v0  ;;  %v70_v1 = vld [vmem:[%s1594_s1 + $0x78] sm:$0xff]  ;;  %v69_v2 = vld [vmem:[%s1594_s1 + $0x70] sm:$0xff]  ;;  %952 = vmatprep.subr.mxu1 %v1017_v0  ;;  %v68_v3 = vld [vmem:[%s1594_s1 + $0x68] sm:$0xff] }
   0x2   :  { %184 = vmatpush1.msra.mxu0 %v70_v1  ;;  %984 = vmatpush1.msra.mxu1 %v70_v1  ;;  %v67_v4 = vld [vmem:[%s1594_s1 + $0x60] sm:$0xff]  ;;  %v66_v5 = vld [vmem:[%s1594_s1 + $0x58] sm:$0xff]  ;;  %v65_v6 = vld [vmem:[%s1594_s1 + $0x50] sm:$0xff] }
   0x3   :  { %185 = vmatprep.subr.mxu0 %v1017_v0  ;;  %953 = vmatprep.subr.mxu1 %v1017_v0  ;;  %v64_v7 = vld [vmem:[%s1594_s1 + $0x48] sm:$0xff]  ;;  %v63_v9 = vld [vmem:[%s1594_s1 + $0x40] sm:$0xff]  ;;  %v62_v10 = vld [vmem:[%s1594_s1 + $0x38] sm:$0xff] }
   0x4   :  { %186 = vmatpush1.msra.mxu0 %v69_v2  ;;  %985 = vmatpush1.msra.mxu1 %v69_v2  ;;  %v120_v8 = vld [vmem:[%s1595_s0 + $0x8] sm:$0xff]  ;;  %v61_v11 = vld [vmem:[%s1594_s1 + $0x30] sm:$0xff]  ;;  %v59_v13 = vld [vmem:[%s1594_s1 + $0x20] sm:$0xff] }
   0x5   :  { %187 = vmatprep.subr.mxu0 %v1017_v0  ;;  %954 = vmatprep.subr.mxu1 %v1017_v0  ;;  %v60_v12 = vld [vmem:[%s1594_s1 + $0x28] sm:$0xff]  ;;  %v58_v14 = vld [vmem:[%s1594_s1 + $0x18] sm:$0xff]  ;;  %v57_v15 = vld [vmem:[%s1594_s1 + $0x10] sm:$0xff] }
   0x6   :  { %188 = vmatpush1.msra.mxu0 %v68_v3  ;;  %986 = vmatpush1.msra.mxu1 %v68_v3  ;;  %v56_v16 = vld [vmem:[%s1594_s1 + $0x8] sm:$0xff]  ;;  %v55_v17 = vld [vmem:[%s1594_s1] sm:$0xff]  ;;  %v86_v18 = vld [vmem:[%s1594_s1 + $0xf8] sm:$0xff] }
   0x7   :  { %189 = vmatprep.subr.mxu0 %v1017_v0  ;;  %955 = vmatprep.subr.mxu1 %v1017_v0  ;;  %v85_v19 = vld [vmem:[%s1594_s1 + $0xf0] sm:$0xff]  ;;  %v84_v20 = vld [vmem:[%s1594_s1 + $0xe8] sm:$0xff]  ;;  %v83_v21 = vld [vmem:[%s1594_s1 + $0xe0] sm:$0xff] }
   0x8   :  { %190 = vmatpush1.msra.mxu0 %v67_v4  ;;  %987 = vmatpush1.msra.mxu1 %v67_v4  ;;  %v82_v22 = vld [vmem:[%s1594_s1 + $0xd8] sm:$0xff]  ;;  %v81_v23 = vld [vmem:[%s1594_s1 + $0xd0] sm:$0xff]  ;;  %v80_v24 = vld [vmem:[%s1594_s1 + $0xc8] sm:$0xff] }
   0x9   :  { %191 = vmatprep.subr.mxu0 %v1017_v0  ;;  %956 = vmatprep.subr.mxu1 %v1017_v0  ;;  %v79_v25 = vld [vmem:[%s1594_s1 + $0xc0] sm:$0xff]  ;;  %v78_v26 = vld [vmem:[%s1594_s1 + $0xb8] sm:$0xff]  ;;  %v77_v27 = vld [vmem:[%s1594_s1 + $0xb0] sm:$0xff] }
   0xa   :  { %192 = vmatpush1.msra.mxu0 %v66_v5  ;;  %988 = vmatpush1.msra.mxu1 %v66_v5  ;;  %v76_v28 = vld [vmem:[%s1594_s1 + $0xa8] sm:$0xff]  ;;  %v75_v29 = vld [vmem:[%s1594_s1 + $0xa0] sm:$0xff]  ;;  %v74_v30 = vld [vmem:[%s1594_s1 + $0x98] sm:$0xff] }
   0xb   :  { %193 = vmatprep.subr.mxu0 %v1017_v0  ;;  %957 = vmatprep.subr.mxu1 %v1017_v0  ;;  %v73_v31 = vld [vmem:[%s1594_s1 + $0x90] sm:$0xff]  ;;  %v72_v32 = vld [vmem:[%s1594_s1 + $0x88] sm:$0xff]  ;;  %v71_v33 = vld [vmem:[%s1594_s1 + $0x80] sm:$0xff] }
   0xc   :  { %194 = vmatpush1.msra.mxu0 %v65_v6  ;;  %247 = vmatprep.mubr.f32.mxu0 %v120_v8  ;;  %v119_v34 = vld [vmem:[%s1595_s0] sm:$0xff]  ;;  %v122_v35 = vld [vmem:[%s1595_s0 + $0x18] sm:$0xff]  ;;  %v168_v36 = vld [vmem:[%s1595_s0 + $0x188] sm:$0xff] }
   0xd   :  { %195 = vmatprep.subr.mxu0 %v1017_v0  ;;  %989 = vmatpush1.msra.mxu1 %v65_v6  ;;  %v167_v37 = vld [vmem:[%s1595_s0 + $0x180] sm:$0xff]  ;;  %v522_v38 = vld [vmem:[%s1596_s2 + $0x78] sm:$0xff]  ;;  %v121_v40 = vld [vmem:[%s1595_s0 + $0x10] sm:$0xff] }
   0xe   :  { %196 = vmatpush1.msra.mxu0 %v64_v7  ;;  %958 = vmatprep.subr.mxu1 %v1017_v0  ;;  %v170_v39 = vld [vmem:[%s1595_s0 + $0x198] sm:$0xff]  ;;  %v521_v41 = vld [vmem:[%s1596_s2 + $0x70] sm:$0xff]  ;;  %v124_v42 = vld [vmem:[%s1595_s0 + $0x28] sm:$0xff] }
   0xf   :  { %197 = vmatprep.subr.mxu0 %v1017_v0  ;;  %990 = vmatpush1.msra.mxu1 %v64_v7  ;;  %v169_v43 = vld [vmem:[%s1595_s0 + $0x190] sm:$0xff]  ;;  %v520_v44 = vld [vmem:[%s1596_s2 + $0x68] sm:$0xff]  ;;  %v123_v46 = vld [vmem:[%s1595_s0 + $0x20] sm:$0xff] }
  0x10   :  { %198 = vmatpush1.msra.mxu0 %v63_v9  ;;  %959 = vmatprep.subr.mxu1 %v1017_v0  ;;  %v172_v45 = vld [vmem:[%s1595_s0 + $0x1a8] sm:$0xff]  ;;  %v519_v47 = vld [vmem:[%s1596_s2 + $0x60] sm:$0xff]  ;;  %v126_v48 = vld [vmem:[%s1595_s0 + $0x38] sm:$0xff] }
  0x11   :  { %199 = vmatprep.subr.mxu0 %v1017_v0  ;;  %991 = vmatpush1.msra.mxu1 %v63_v9  ;;  %v171_v49 = vld [vmem:[%s1595_s0 + $0x1a0] sm:$0xff]  ;;  %v518_v50 = vld [vmem:[%s1596_s2 + $0x58] sm:$0xff]  ;;  %v125_v52 = vld [vmem:[%s1595_s0 + $0x30] sm:$0xff] }
  0x12   :  { %200 = vmatpush1.msra.mxu0 %v62_v10  ;;  %960 = vmatprep.subr.mxu1 %v1017_v0  ;;  %v174_v51 = vld [vmem:[%s1595_s0 + $0x1b8] sm:$0xff]  ;;  %v517_v53 = vld [vmem:[%s1596_s2 + $0x50] sm:$0xff]  ;;  %v128_v54 = vld [vmem:[%s1595_s0 + $0x48] sm:$0xff] }
  0x13   :  { %201 = vmatprep.subr.mxu0 %v1017_v0  ;;  %992 = vmatpush1.msra.mxu1 %v62_v10  ;;  %v173_v55 = vld [vmem:[%s1595_s0 + $0x1b0] sm:$0xff]  ;;  %v516_v56 = vld [vmem:[%s1596_s2 + $0x48] sm:$0xff]  ;;  %v127_v58 = vld [vmem:[%s1595_s0 + $0x40] sm:$0xff] }
  0x14   :  { %202 = vmatpush1.msra.mxu0 %v61_v11  ;;  %961 = vmatprep.subr.mxu1 %v1017_v0  ;;  %v176_v57 = vld [vmem:[%s1595_s0 + $0x1c8] sm:$0xff]  ;;  %v515_v59 = vld [vmem:[%s1596_s2 + $0x40] sm:$0xff]  ;;  %v130_v60 = vld [vmem:[%s1595_s0 + $0x58] sm:$0xff] }
  0x15   :  { %203 = vmatprep.subr.mxu0 %v1017_v0  ;;  %993 = vmatpush1.msra.mxu1 %v61_v11  ;;  %v175_v61 = vld [vmem:[%s1595_s0 + $0x1c0] sm:$0xff]  ;;  %v514_v62 = vld [vmem:[%s1596_s2 + $0x38] sm:$0xff]  ;;  %v513_v1 = vld [vmem:[%s1596_s2 + $0x30] sm:$0xff] }
  0x16   :  { %204 = vmatpush1.msra.mxu0 %v60_v12  ;;  %962 = vmatprep.subr.mxu1 %v1017_v0  ;;  %v178_v63 = vld [vmem:[%s1595_s0 + $0x1d8] sm:$0xff]  ;;  %v132_v2 = vld [vmem:[%s1595_s0 + $0x68] sm:$0xff]  ;;  %v177_v3 = vld [vmem:[%s1595_s0 + $0x1d0] sm:$0xff] }
  0x17   :  { %205 = vmatprep.subr.mxu0 %v1017_v0  ;;  %994 = vmatpush1.msra.mxu1 %v60_v12  ;;  %v512_v4 = vld [vmem:[%s1596_s2 + $0x28] sm:$0xff]  ;;  %v131_v6 = vld [vmem:[%s1595_s0 + $0x60] sm:$0xff]  ;;  %v134_v8 = vld [vmem:[%s1595_s0 + $0x78] sm:$0xff] }
  0x18   :  { %206 = vmatpush1.msra.mxu0 %v59_v13  ;;  %963 = vmatprep.subr.mxu1 %v1017_v0  ;;  %v180_v5 = vld [vmem:[%s1595_s0 + $0x1e8] sm:$0xff]  ;;  %v511_v7 = vld [vmem:[%s1596_s2 + $0x20] sm:$0xff]  ;;  %v510_v10 = vld [vmem:[%s1596_s2 + $0x18] sm:$0xff] }
  0x19   :  { %207 = vmatprep.subr.mxu0 %v1017_v0  ;;  %995 = vmatpush1.msra.mxu1 %v59_v13  ;;  %v179_v9 = vld [vmem:[%s1595_s0 + $0x1e0] sm:$0xff]  ;;  %v182_v11 = vld [vmem:[%s1595_s0 + $0x1f8] sm:$0xff]  ;;  %v133_v12 = vld [vmem:[%s1595_s0 + $0x70] sm:$0xff] }
  0x1a   :  { %208 = vmatpush1.msra.mxu0 %v58_v14  ;;  %964 = vmatprep.subr.mxu1 %v1017_v0  ;;  %v509_v13 = vld [vmem:[%s1596_s2 + $0x10] sm:$0xff] }
  0x1b   :  { %209 = vmatprep.subr.mxu0 %v1017_v0  ;;  %996 = vmatpush1.msra.mxu1 %v58_v14  ;;  %v136_v14 = vld [vmem:[%s1595_s0 + $0x88] sm:$0xff] }
  0x1c   :  { %210 = vmatpush1.msra.mxu0 %v57_v15  ;;  %965 = vmatprep.subr.mxu1 %v1017_v0 }
  0x1d   :  { %211 = vmatprep.subr.mxu0 %v1017_v0  ;;  %997 = vmatpush1.msra.mxu1 %v57_v15  ;;  %v181_v15 = vld [vmem:[%s1595_s0 + $0x1f0] sm:$0xff] }
  0x1e   :  { %212 = vmatpush1.msra.mxu0 %v56_v16  ;;  %966 = vmatprep.subr.mxu1 %v1017_v0 }
  0x1f   :  { %213 = vmatprep.subr.mxu0 %v1017_v0  ;;  %998 = vmatpush1.msra.mxu1 %v56_v16  ;;  %v135_v16 = vld [vmem:[%s1595_s0 + $0x80] sm:$0xff] }
  0x20   :  { %214 = vmatpush1.msra.mxu0 %v55_v17  ;;  %967 = vmatprep.subr.mxu1 %v1017_v0 }
  0x21   :  { %215 = vmatprep.subr.mxu0 %v1017_v0  ;;  %999 = vmatpush1.msra.mxu1 %v55_v17  ;;  %v138_v17 = vld [vmem:[%s1595_s0 + $0x98] sm:$0xff] }
  0x22   :  { %216 = vmatpush2.msra.mxu0 %v86_v18  ;;  %968 = vmatprep.subr.mxu1 %v1017_v0 }
  0x23   :  { %217 = vmatprep.subr.mxu0 %v1017_v0  ;;  %1000 = vmatpush2.msra.mxu1 %v86_v18  ;;  %v137_v18 = vld [vmem:[%s1595_s0 + $0x90] sm:$0xff] }
  0x24   :  { %218 = vmatpush2.msra.mxu0 %v85_v19  ;;  %969 = vmatprep.subr.mxu1 %v1017_v0 }
  0x25   :  { %219 = vmatprep.subr.mxu0 %v1017_v0  ;;  %1001 = vmatpush2.msra.mxu1 %v85_v19  ;;  %v140_v19 = vld [vmem:[%s1595_s0 + $0xa8] sm:$0xff] }
  0x26   :  { %220 = vmatpush2.msra.mxu0 %v84_v20  ;;  %970 = vmatprep.subr.mxu1 %v1017_v0 }
  0x27   :  { %221 = vmatprep.subr.mxu0 %v1017_v0  ;;  %1002 = vmatpush2.msra.mxu1 %v84_v20  ;;  %v139_v20 = vld [vmem:[%s1595_s0 + $0xa0] sm:$0xff] }
  0x28   :  { %222 = vmatpush2.msra.mxu0 %v83_v21  ;;  %971 = vmatprep.subr.mxu1 %v1017_v0 }
  0x29   :  { %223 = vmatprep.subr.mxu0 %v1017_v0  ;;  %1003 = vmatpush2.msra.mxu1 %v83_v21  ;;  %v142_v21 = vld [vmem:[%s1595_s0 + $0xb8] sm:$0xff] }
  0x2a   :  { %224 = vmatpush2.msra.mxu0 %v82_v22  ;;  %972 = vmatprep.subr.mxu1 %v1017_v0 }
  0x2b   :  { %225 = vmatprep.subr.mxu0 %v1017_v0  ;;  %1004 = vmatpush2.msra.mxu1 %v82_v22  ;;  %v141_v22 = vld [vmem:[%s1595_s0 + $0xb0] sm:$0xff] }
  0x2c   :  { %226 = vmatpush2.msra.mxu0 %v81_v23  ;;  %973 = vmatprep.subr.mxu1 %v1017_v0 }
  0x2d   :  { %227 = vmatprep.subr.mxu0 %v1017_v0  ;;  %1005 = vmatpush2.msra.mxu1 %v81_v23  ;;  %v144_v23 = vld [vmem:[%s1595_s0 + $0xc8] sm:$0xff] }
  0x2e   :  { %228 = vmatpush2.msra.mxu0 %v80_v24  ;;  %974 = vmatprep.subr.mxu1 %v1017_v0 }
  0x2f   :  { %229 = vmatprep.subr.mxu0 %v1017_v0  ;;  %1006 = vmatpush2.msra.mxu1 %v80_v24  ;;  %v143_v24 = vld [vmem:[%s1595_s0 + $0xc0] sm:$0xff] }
  0x30   :  { %230 = vmatpush2.msra.mxu0 %v79_v25  ;;  %975 = vmatprep.subr.mxu1 %v1017_v0 }
  0x31   :  { %231 = vmatprep.subr.mxu0 %v1017_v0  ;;  %1007 = vmatpush2.msra.mxu1 %v79_v25  ;;  %v146_v25 = vld [vmem:[%s1595_s0 + $0xd8] sm:$0xff] }
  0x32   :  { %232 = vmatpush2.msra.mxu0 %v78_v26  ;;  %976 = vmatprep.subr.mxu1 %v1017_v0 }
  0x33   :  { %233 = vmatprep.subr.mxu0 %v1017_v0  ;;  %1008 = vmatpush2.msra.mxu1 %v78_v26  ;;  %v145_v26 = vld [vmem:[%s1595_s0 + $0xd0] sm:$0xff] }
  0x34   :  { %234 = vmatpush2.msra.mxu0 %v77_v27  ;;  %977 = vmatprep.subr.mxu1 %v1017_v0 }
  0x35   :  { %235 = vmatprep.subr.mxu0 %v1017_v0  ;;  %1009 = vmatpush2.msra.mxu1 %v77_v27  ;;  %v148_v27 = vld [vmem:[%s1595_s0 + $0xe8] sm:$0xff] }
  0x36   :  { %236 = vmatpush2.msra.mxu0 %v76_v28  ;;  %978 = vmatprep.subr.mxu1 %v1017_v0 }
  0x37   :  { %237 = vmatprep.subr.mxu0 %v1017_v0  ;;  %1010 = vmatpush2.msra.mxu1 %v76_v28  ;;  %v147_v28 = vld [vmem:[%s1595_s0 + $0xe0] sm:$0xff] }
  0x38   :  { %238 = vmatpush2.msra.mxu0 %v75_v29  ;;  %979 = vmatprep.subr.mxu1 %v1017_v0 }
  0x39   :  { %239 = vmatprep.subr.mxu0 %v1017_v0  ;;  %1011 = vmatpush2.msra.mxu1 %v75_v29  ;;  %v150_v29 = vld [vmem:[%s1595_s0 + $0xf8] sm:$0xff] }
  0x3a   :  { %240 = vmatpush2.msra.mxu0 %v74_v30  ;;  %980 = vmatprep.subr.mxu1 %v1017_v0 }
  0x3b   :  { %241 = vmatprep.subr.mxu0 %v1017_v0  ;;  %1012 = vmatpush2.msra.mxu1 %v74_v30  ;;  %v149_v30 = vld [vmem:[%s1595_s0 + $0xf0] sm:$0xff] }
  0x3c   :  { %242 = vmatpush2.msra.mxu0 %v73_v31  ;;  %981 = vmatprep.subr.mxu1 %v1017_v0 }
  0x3d   :  { %243 = vmatprep.subr.mxu0 %v1017_v0  ;;  %1013 = vmatpush2.msra.mxu1 %v73_v31  ;;  %v152_v31 = vld [vmem:[%s1595_s0 + $0x108] sm:$0xff] }
  0x3e   :  { %244 = vmatpush2.msra.mxu0 %v72_v32  ;;  %982 = vmatprep.subr.mxu1 %v1017_v0 }
  0x3f   :  { %245 = vmatprep.subr.mxu0 %v1017_v0  ;;  %1014 = vmatpush2.msra.mxu1 %v72_v32  ;;  %v151_v32 = vld [vmem:[%s1595_s0 + $0x100] sm:$0xff] }
  0x40   :  { %246 = vmatpush2.msra.mxu0 %v71_v33  ;;  %983 = vmatprep.subr.mxu1 %v1017_v0  ;;  %v129_v0 = vld [vmem:[%s1595_s0 + $0x50] sm:$0xff] }
  0x41   :  { %248 = vmatmul.mubr.f32.vlgmr.msra.gmra.mxu0 %v119_v34  ;;  %1015 = vmatpush2.msra.mxu1 %v71_v33  ;;  %v154_v33 = vld [vmem:[%s1595_s0 + $0x118] sm:$0xff]  ;;  %v508_v34 = vld [vmem:[%s1596_s2 + $0x8] sm:$0xff] }
  0x42   :  { %252 = vmatprep.mubr.f32.mxu0 %v122_v35  ;;  %367 = vmatprep.mubr.f32.mxu1 %v168_v36  ;;  %v153_v35 = vld [vmem:[%s1595_s0 + $0x110] sm:$0xff]  ;;  %v156_v36 = vld [vmem:[%s1595_s0 + $0x128] sm:$0xff] }
  0x43   :  { %368 = vmatmul.mubr.f32.vlgmr.msra.gmra.mxu1 %v167_v37  ;;  %872 = vmatprep.subr.mxu1 %v522_v38  ;;  %v507_v37 = vld [vmem:[%s1596_s2] sm:$0xff] }
  0x44   :  { %372 = vmatprep.mubr.f32.mxu1 %v170_v39  ;;  %873 = vmatpush3.msra.mxu1 %v522_v38  ;;  %v155_v38 = vld [vmem:[%s1595_s0 + $0x120] sm:$0xff]  ;;  %v158_v39 = vld [vmem:[%s1595_s0 + $0x138] sm:$0xff] }
  0x45   :  { %253 = vmatmul.mubr.f32.gmra.mxu0 %v121_v40  ;;  %874 = vmatprep.subr.mxu1 %v521_v41  ;;  %v157_v40 = vld [vmem:[%s1595_s0 + $0x130] sm:$0xff] }
  0x46   :  { %257 = vmatprep.mubr.f32.mxu0 %v124_v42  ;;  %875 = vmatpush3.msra.mxu1 %v521_v41  ;;  %v160_v41 = vld [vmem:[%s1595_s0 + $0x148] sm:$0xff]  ;;  %v159_v42 = vld [vmem:[%s1595_s0 + $0x140] sm:$0xff] }
  0x47   :  { %373 = vmatmul.mubr.f32.gmra.mxu1 %v169_v43  ;;  %876 = vmatprep.subr.mxu1 %v520_v44  ;;  %v162_v43 = vld [vmem:[%s1595_s0 + $0x158] sm:$0xff] }
  0x48   :  { %377 = vmatprep.mubr.f32.mxu1 %v172_v45  ;;  %877 = vmatpush3.msra.mxu1 %v520_v44  ;;  %v161_v44 = vld [vmem:[%s1595_s0 + $0x150] sm:$0xff]  ;;  %v164_v45 = vld [vmem:[%s1595_s0 + $0x168] sm:$0xff] }
  0x49   :  { %258 = vmatmul.mubr.f32.gmra.mxu0 %v123_v46  ;;  %878 = vmatprep.subr.mxu1 %v519_v47  ;;  %v163_v46 = vld [vmem:[%s1595_s0 + $0x160] sm:$0xff] }
  0x4a   :  { %262 = vmatprep.mubr.f32.mxu0 %v126_v48  ;;  %879 = vmatpush3.msra.mxu1 %v519_v47  ;;  %v166_v47 = vld [vmem:[%s1595_s0 + $0x178] sm:$0xff]  ;;  %v165_v48 = vld [vmem:[%s1595_s0 + $0x170] sm:$0xff] }
  0x4b   :  { %378 = vmatmul.mubr.f32.gmra.mxu1 %v171_v49  ;;  %880 = vmatprep.subr.mxu1 %v518_v50 }
  0x4c   :  { %382 = vmatprep.mubr.f32.mxu1 %v174_v51  ;;  %881 = vmatpush3.msra.mxu1 %v518_v50 }
  0x4d   :  { %263 = vmatmul.mubr.f32.gmra.mxu0 %v125_v52  ;;  %882 = vmatprep.subr.mxu1 %v517_v53 }
  0x4e   :  { %267 = vmatprep.mubr.f32.mxu0 %v128_v54  ;;  %883 = vmatpush3.msra.mxu1 %v517_v53 }
  0x4f   :  { %383 = vmatmul.mubr.f32.gmra.mxu1 %v173_v55  ;;  %884 = vmatprep.subr.mxu1 %v516_v56 }
  0x50   :  { %387 = vmatprep.mubr.f32.mxu1 %v176_v57  ;;  %885 = vmatpush3.msra.mxu1 %v516_v56 }
  0x51   :  { %268 = vmatmul.mubr.f32.gmra.mxu0 %v127_v58  ;;  %886 = vmatprep.subr.mxu1 %v515_v59 }
  0x52   :  { %272 = vmatprep.mubr.f32.mxu0 %v130_v60  ;;  %887 = vmatpush3.msra.mxu1 %v515_v59 }
  0x53   :  { %388 = vmatmul.mubr.f32.gmra.mxu1 %v175_v61  ;;  %888 = vmatprep.subr.mxu1 %v514_v62 }
  0x54   :  { %392 = vmatprep.mubr.f32.mxu1 %v178_v63  ;;  %889 = vmatpush3.msra.mxu1 %v514_v62 }
  0x55   :  { %273 = vmatmul.mubr.f32.gmra.mxu0 %v129_v0  ;;  %890 = vmatprep.subr.mxu1 %v513_v1 }
  0x56   :  { %277 = vmatprep.mubr.f32.mxu0 %v132_v2  ;;  %891 = vmatpush3.msra.mxu1 %v513_v1 }
  0x57   :  { %393 = vmatmul.mubr.f32.gmra.mxu1 %v177_v3  ;;  %892 = vmatprep.subr.mxu1 %v512_v4 }
  0x58   :  { %397 = vmatprep.mubr.f32.mxu1 %v180_v5  ;;  %893 = vmatpush3.msra.mxu1 %v512_v4 }
  0x59   :  { %278 = vmatmul.mubr.f32.gmra.mxu0 %v131_v6  ;;  %894 = vmatprep.subr.mxu1 %v511_v7 }
  0x5a   :  { %282 = vmatprep.mubr.f32.mxu0 %v134_v8  ;;  %895 = vmatpush3.msra.mxu1 %v511_v7 }
  0x5b   :  { %398 = vmatmul.mubr.f32.gmra.mxu1 %v179_v9  ;;  %896 = vmatprep.subr.mxu1 %v510_v10 }
  0x5c   :  { %402 = vmatprep.mubr.f32.mxu1 %v182_v11  ;;  %897 = vmatpush3.msra.mxu1 %v510_v10 }
  0x5d   :  { %283 = vmatmul.mubr.f32.gmra.mxu0 %v133_v12  ;;  %898 = vmatprep.subr.mxu1 %v509_v13 }
  0x5e   :  { %287 = vmatprep.mubr.f32.mxu0 %v136_v14  ;;  %899 = vmatpush3.msra.mxu1 %v509_v13 }
  0x5f   :  { %403 = vmatmul.mubr.f32.gmra.mxu1 %v181_v15  ;;  %900 = vmatprep.subr.mxu1 %v508_v34 }
  0x60   :  { %901 = vmatpush3.msra.mxu1 %v508_v34 }
  0x61   :  { %288 = vmatmul.mubr.f32.gmra.mxu0 %v135_v16  ;;  %902 = vmatprep.subr.mxu1 %v507_v37 }
  0x62   :  { %292 = vmatprep.mubr.f32.mxu0 %v138_v17  ;;  %903 = vmatpush3.msra.mxu1 %v507_v37 }
  0x65   :  { %293 = vmatmul.mubr.f32.gmra.mxu0 %v137_v18 }
  0x66   :  { %297 = vmatprep.mubr.f32.mxu0 %v140_v19 }
  0x69   :  { %298 = vmatmul.mubr.f32.gmra.mxu0 %v139_v20 }
  0x6a   :  { %302 = vmatprep.mubr.f32.mxu0 %v142_v21 }
  0x6d   :  { %303 = vmatmul.mubr.f32.gmra.mxu0 %v141_v22 }
  0x6e   :  { %307 = vmatprep.mubr.f32.mxu0 %v144_v23 }
  0x71   :  { %308 = vmatmul.mubr.f32.gmra.mxu0 %v143_v24 }
  0x72   :  { %312 = vmatprep.mubr.f32.mxu0 %v146_v25 }
  0x75   :  { %313 = vmatmul.mubr.f32.gmra.mxu0 %v145_v26 }
  0x76   :  { %317 = vmatprep.mubr.f32.mxu0 %v148_v27 }
  0x79   :  { %318 = vmatmul.mubr.f32.gmra.mxu0 %v147_v28 }
  0x7a   :  { %322 = vmatprep.mubr.f32.mxu0 %v150_v29 }
  0x7d   :  { %323 = vmatmul.mubr.f32.gmra.mxu0 %v149_v30 }
  0x7e   :  { %327 = vmatprep.mubr.f32.mxu0 %v152_v31 }
  0x81   :  { %328 = vmatmul.mubr.f32.gmra.mxu0 %v151_v32 }
  0x82   :  { %332 = vmatprep.mubr.f32.mxu0 %v154_v33 }
  0x85   :  { %333 = vmatmul.mubr.f32.gmra.mxu0 %v153_v35 }
  0x86   :  { %337 = vmatprep.mubr.f32.mxu0 %v156_v36 }
  0x89   :  { %338 = vmatmul.mubr.f32.gmra.mxu0 %v155_v38 }
  0x8a   :  { %342 = vmatprep.mubr.f32.mxu0 %v158_v39 }
  0x8d   :  { %343 = vmatmul.mubr.f32.gmra.mxu0 %v157_v40 }
  0x8e   :  { %347 = vmatprep.mubr.f32.mxu0 %v160_v41 }
  0x91   :  { %348 = vmatmul.mubr.f32.gmra.mxu0 %v159_v42 }
  0x92   :  { %352 = vmatprep.mubr.f32.mxu0 %v162_v43 }
  0x95   :  { %353 = vmatmul.mubr.f32.gmra.mxu0 %v161_v44 }
  0x96   :  { %357 = vmatprep.mubr.f32.mxu0 %v164_v45 }
  0x99   :  { %358 = vmatmul.mubr.f32.gmra.mxu0 %v163_v46 }
  0x9a   :  { %362 = vmatprep.mubr.f32.mxu0 %v166_v47 }
  0x9d   :  { %363 = vmatmul.mubr.f32.gmra.mxu0 %v165_v48 }
 0x101   :  { %v249_v49 = vpop.f32.mrf.mxu0 }
 0x102   :  { %904 = vmatprep.mubr.f32.mxu1 %v249_v49  ;;  %v1464_v49 = vld [vmem:[%s1597_s3] ss:$0 sm:$0xff] }
 0x103   :  { %v251_v50 = vpop.f32.mrf.mxu0  ;;  %v1443_v51 = vpop.f32.mrf.mxu1 }
 0x105   :  { %v254_v52 = vpop.f32.mrf.mxu0  ;;  %v371_v53 = vpop.f32.mrf.mxu1 }
 0x106   :  { %905 = vmatmul.mubr.f32.vlgmr.msra.gmra.mxu1 %v254_v52 }
 0x107   :  { %v256_v54 = vpop.f32.mrf.mxu0  ;;  %v1445_v55 = vpop.f32.mrf.mxu1 }
 0x109   :  { %v259_v56 = vpop.f32.mrf.mxu0  ;;  %v376_v57 = vpop.f32.mrf.mxu1 }
 0x10a   :  { %907 = vmatprep.mubr.f32.mxu1 %v259_v56 }
 0x10b   :  { %v261_v58 = vpop.f32.mrf.mxu0  ;;  %v1447_v59 = vpop.f32.mrf.mxu1 }
 0x10d   :  { %v264_v60 = vpop.f32.mrf.mxu0  ;;  %v381_v61 = vpop.f32.mrf.mxu1 }
 0x10e   :  { %908 = vmatmul.mubr.f32.gmra.mxu1 %v264_v60 }
 0x10f   :  { %v266_v62 = vpop.f32.mrf.mxu0  ;;  %v1449_v63 = vpop.f32.mrf.mxu1 }
 0x111   :  { %v269_v0 = vpop.f32.mrf.mxu0  ;;  %v386_v1 = vpop.f32.mrf.mxu1 }
 0x112   :  { %910 = vmatprep.mubr.f32.mxu1 %v269_v0 }
 0x113   :  { %v271_v2 = vpop.f32.mrf.mxu0  ;;  %v1451_v3 = vpop.f32.mrf.mxu1 }
 0x115   :  { %v274_v4 = vpop.f32.mrf.mxu0  ;;  %v391_v5 = vpop.f32.mrf.mxu1 }
 0x116   :  { %911 = vmatmul.mubr.f32.gmra.mxu1 %v274_v4 }
 0x117   :  { %v276_v6 = vpop.f32.mrf.mxu0  ;;  %v1453_v7 = vpop.f32.mrf.mxu1 }
 0x119   :  { %v279_v8 = vpop.f32.mrf.mxu0  ;;  %v396_v9 = vpop.f32.mrf.mxu1 }
 0x11a   :  { %913 = vmatprep.mubr.f32.mxu1 %v279_v8 }
 0x11b   :  { %v281_v10 = vpop.f32.mrf.mxu0  ;;  %v399_v11 = vpop.f32.mrf.mxu1 }
 0x11d   :  { %v284_v12 = vpop.f32.mrf.mxu0  ;;  %v401_v13 = vpop.f32.mrf.mxu1 }
 0x11e   :  { %914 = vmatmul.mubr.f32.gmra.mxu1 %v284_v12 }
 0x11f   :  { %v286_v14 = vpop.f32.mrf.mxu0  ;;  %v404_v15 = vpop.f32.mrf.mxu1 }
 0x121   :  { %v289_v16 = vpop.f32.mrf.mxu0  ;;  %v406_v17 = vpop.f32.mrf.mxu1 }
 0x122   :  { %916 = vmatprep.mubr.f32.mxu1 %v289_v16 }
 0x123   :  { %v291_v18 = vpop.f32.mrf.mxu0 }
 0x125   :  { %v294_v19 = vpop.f32.mrf.mxu0 }
 0x126   :  { %917 = vmatmul.mubr.f32.gmra.mxu1 %v294_v19 }
 0x127   :  { %v296_v20 = vpop.f32.mrf.mxu0 }
 0x129   :  { %v299_v21 = vpop.f32.mrf.mxu0 }
 0x12a   :  { %919 = vmatprep.mubr.f32.mxu1 %v299_v21 }
 0x12b   :  { %v301_v22 = vpop.f32.mrf.mxu0 }
 0x12d   :  { %v304_v23 = vpop.f32.mrf.mxu0 }
 0x12e   :  { %920 = vmatmul.mubr.f32.gmra.mxu1 %v304_v23 }
 0x12f   :  { %v306_v24 = vpop.f32.mrf.mxu0 }
 0x131   :  { %v309_v25 = vpop.f32.mrf.mxu0 }
 0x132   :  { %922 = vmatprep.mubr.f32.mxu1 %v309_v25 }
 0x133   :  { %v311_v26 = vpop.f32.mrf.mxu0 }
 0x135   :  { %v314_v27 = vpop.f32.mrf.mxu0 }
 0x136   :  { %923 = vmatmul.mubr.f32.gmra.mxu1 %v314_v27 }
 0x137   :  { %v316_v28 = vpop.f32.mrf.mxu0 }
 0x139   :  { %v319_v29 = vpop.f32.mrf.mxu0 }
 0x13a   :  { %925 = vmatprep.mubr.f32.mxu1 %v319_v29 }
 0x13b   :  { %v321_v30 = vpop.f32.mrf.mxu0 }
 0x13d   :  { %v324_v31 = vpop.f32.mrf.mxu0 }
 0x13e   :  { %926 = vmatmul.mubr.f32.gmra.mxu1 %v324_v31 }
 0x13f   :  { %v326_v32 = vpop.f32.mrf.mxu0 }
 0x141   :  { %v329_v33 = vpop.f32.mrf.mxu0 }
 0x142   :  { %928 = vmatprep.mubr.f32.mxu1 %v329_v33 }
 0x143   :  { %v331_v34 = vpop.f32.mrf.mxu0 }
 0x145   :  { %v334_v35 = vpop.f32.mrf.mxu0 }
 0x146   :  { %929 = vmatmul.mubr.f32.gmra.mxu1 %v334_v35 }
 0x147   :  { %v336_v36 = vpop.f32.mrf.mxu0 }
 0x149   :  { %v339_v37 = vpop.f32.mrf.mxu0 }
 0x14a   :  { %931 = vmatprep.mubr.f32.mxu1 %v339_v37 }
 0x14b   :  { %v341_v38 = vpop.f32.mrf.mxu0 }
 0x14d   :  { %v344_v39 = vpop.f32.mrf.mxu0 }
 0x14e   :  { %932 = vmatmul.mubr.f32.gmra.mxu1 %v344_v39 }
 0x14f   :  { %v346_v40 = vpop.f32.mrf.mxu0 }
 0x151   :  { %v349_v41 = vpop.f32.mrf.mxu0 }
 0x152   :  { %934 = vmatprep.mubr.f32.mxu1 %v349_v41 }
 0x153   :  { %v351_v42 = vpop.f32.mrf.mxu0 }
 0x155   :  { %v354_v43 = vpop.f32.mrf.mxu0 }
 0x156   :  { %935 = vmatmul.mubr.f32.gmra.mxu1 %v354_v43 }
 0x157   :  { %v356_v44 = vpop.f32.mrf.mxu0 }
 0x159   :  { %v359_v45 = vpop.f32.mrf.mxu0 }
 0x15a   :  { %937 = vmatprep.mubr.f32.mxu1 %v359_v45 }
 0x15b   :  { %v361_v46 = vpop.f32.mrf.mxu0 }
 0x15d   :  { %v364_v47 = vpop.f32.mrf.mxu0 }
 0x15e   :  { %938 = vmatmul.mubr.f32.gmra.mxu1 %v364_v47 }
 0x15f   :  { %v366_v48 = vpop.f32.mrf.mxu0  ;;  %940 = vmatprep.mubr.f32.mxu1 %v1443_v51 }
 0x162   :  { %941 = vmatmul.mubr.f32.gmra.mxu1 %v1445_v55 }
 0x163   :  { %943 = vmatprep.mubr.f32.mxu1 %v1447_v59 }
 0x166   :  { %944 = vmatmul.mubr.f32.gmra.mxu1 %v1449_v63 }
 0x167   :  { %946 = vmatprep.mubr.f32.mxu1 %v1451_v3 }
 0x16a   :  { %947 = vmatmul.mubr.f32.gmra.mxu1 %v1453_v7 }
 0x16b   :  { %949 = vmatprep.mubr.f32.mxu1 %v399_v11 }
 0x16e   :  { %950 = vmatmul.mubr.f32.gmra.mxu1 %v404_v15 }
 0x1c6   :  { %v906_v50 = vpop.f32.mrf.mxu1 }
 0x1c7   :  { %v602_v51 = vadd.f32 %v906_v50, %v1464_v49 }
 0x1c8   :  { %v596_v52 = vpop.f32.mrf.mxu1 }
 0x1c9   :  { %v756_v53 = vmax.f32 %v602_v51, 0.0  ;;  %v597_v54 = vadd.f32 %v1464_v49, %v596_v52 }
 0x1cb   :  { %788 = vst [vmem:[%s1598_s4 + $0x8] sm:$0xff] %v756_v53  ;;  %v755_v55 = vmax.f32 %v597_v54, 0.0 }
 0x1cd   :  { %787 = vst [vmem:[%s1598_s4] sm:$0xff] %v755_v55 }
 0x1ce   :  { %v909_v56 = vpop.f32.mrf.mxu1 }
 0x1cf   :  { %v612_v57 = vadd.f32 %v909_v56, %v1464_v49 }
 0x1d0   :  { %v606_v58 = vpop.f32.mrf.mxu1 }
 0x1d1   :  { %v758_v59 = vmax.f32 %v612_v57, 0.0  ;;  %v607_v60 = vadd.f32 %v1464_v49, %v606_v58 }
 0x1d3   :  { %790 = vst [vmem:[%s1598_s4 + $0x18] sm:$0xff] %v758_v59  ;;  %v757_v61 = vmax.f32 %v607_v60, 0.0 }
 0x1d5   :  { %789 = vst [vmem:[%s1598_s4 + $0x10] sm:$0xff] %v757_v61 }
 0x1d6   :  { %v912_v62 = vpop.f32.mrf.mxu1 }
 0x1d7   :  { %v622_v63 = vadd.f32 %v912_v62, %v1464_v49 }
 0x1d8   :  { %v616_v0 = vpop.f32.mrf.mxu1 }
 0x1d9   :  { %v760_v1 = vmax.f32 %v622_v63, 0.0  ;;  %v617_v2 = vadd.f32 %v1464_v49, %v616_v0 }
 0x1db   :  { %792 = vst [vmem:[%s1598_s4 + $0x28] sm:$0xff] %v760_v1  ;;  %v759_v3 = vmax.f32 %v617_v2, 0.0 }
 0x1dd   :  { %791 = vst [vmem:[%s1598_s4 + $0x20] sm:$0xff] %v759_v3 }
 0x1de   :  { %v915_v4 = vpop.f32.mrf.mxu1 }
 0x1df   :  { %v632_v5 = vadd.f32 %v915_v4, %v1464_v49 }
 0x1e0   :  { %v626_v6 = vpop.f32.mrf.mxu1 }
 0x1e1   :  { %v762_v7 = vmax.f32 %v632_v5, 0.0  ;;  %v627_v8 = vadd.f32 %v1464_v49, %v626_v6 }
 0x1e3   :  { %794 = vst [vmem:[%s1598_s4 + $0x38] sm:$0xff] %v762_v7  ;;  %v761_v9 = vmax.f32 %v627_v8, 0.0 }
 0x1e5   :  { %793 = vst [vmem:[%s1598_s4 + $0x30] sm:$0xff] %v761_v9 }
 0x1e6   :  { %v918_v10 = vpop.f32.mrf.mxu1 }
 0x1e7   :  { %v642_v11 = vadd.f32 %v918_v10, %v1464_v49 }
 0x1e8   :  { %v636_v12 = vpop.f32.mrf.mxu1 }
 0x1e9   :  { %v764_v13 = vmax.f32 %v642_v11, 0.0  ;;  %v637_v14 = vadd.f32 %v1464_v49, %v636_v12 }
 0x1eb   :  { %796 = vst [vmem:[%s1598_s4 + $0x48] sm:$0xff] %v764_v13  ;;  %v763_v15 = vmax.f32 %v637_v14, 0.0 }
 0x1ed   :  { %795 = vst [vmem:[%s1598_s4 + $0x40] sm:$0xff] %v763_v15 }
 0x1ee   :  { %v921_v16 = vpop.f32.mrf.mxu1 }
 0x1ef   :  { %v652_v17 = vadd.f32 %v921_v16, %v1464_v49 }
 0x1f0   :  { %v646_v18 = vpop.f32.mrf.mxu1 }
 0x1f1   :  { %v766_v19 = vmax.f32 %v652_v17, 0.0  ;;  %v647_v20 = vadd.f32 %v1464_v49, %v646_v18 }
 0x1f3   :  { %798 = vst [vmem:[%s1598_s4 + $0x58] sm:$0xff] %v766_v19  ;;  %v765_v21 = vmax.f32 %v647_v20, 0.0 }
 0x1f5   :  { %797 = vst [vmem:[%s1598_s4 + $0x50] sm:$0xff] %v765_v21 }
 0x1f6   :  { %v924_v22 = vpop.f32.mrf.mxu1 }
 0x1f7   :  { %v662_v23 = vadd.f32 %v924_v22, %v1464_v49 }
 0x1f8   :  { %v656_v24 = vpop.f32.mrf.mxu1 }
 0x1f9   :  { %v768_v25 = vmax.f32 %v662_v23, 0.0  ;;  %v657_v26 = vadd.f32 %v1464_v49, %v656_v24 }
 0x1fb   :  { %800 = vst [vmem:[%s1598_s4 + $0x68] sm:$0xff] %v768_v25  ;;  %v767_v27 = vmax.f32 %v657_v26, 0.0 }
 0x1fd   :  { %799 = vst [vmem:[%s1598_s4 + $0x60] sm:$0xff] %v767_v27 }
 0x1fe   :  { %v927_v28 = vpop.f32.mrf.mxu1 }
 0x1ff   :  { %v672_v29 = vadd.f32 %v927_v28, %v1464_v49 }
 0x200   :  { %v666_v30 = vpop.f32.mrf.mxu1 }
 0x201   :  { %v770_v31 = vmax.f32 %v672_v29, 0.0  ;;  %v667_v32 = vadd.f32 %v1464_v49, %v666_v30 }
 0x203   :  { %802 = vst [vmem:[%s1598_s4 + $0x78] sm:$0xff] %v770_v31  ;;  %v769_v33 = vmax.f32 %v667_v32, 0.0 }
 0x205   :  { %801 = vst [vmem:[%s1598_s4 + $0x70] sm:$0xff] %v769_v33 }
 0x206   :  { %v930_v34 = vpop.f32.mrf.mxu1 }
 0x207   :  { %v682_v35 = vadd.f32 %v930_v34, %v1464_v49 }
 0x208   :  { %v676_v36 = vpop.f32.mrf.mxu1 }
 0x209   :  { %v772_v37 = vmax.f32 %v682_v35, 0.0  ;;  %v677_v38 = vadd.f32 %v1464_v49, %v676_v36 }
 0x20b   :  { %804 = vst [vmem:[%s1598_s4 + $0x88] sm:$0xff] %v772_v37  ;;  %v771_v39 = vmax.f32 %v677_v38, 0.0 }
 0x20d   :  { %803 = vst [vmem:[%s1598_s4 + $0x80] sm:$0xff] %v771_v39 }
 0x20e   :  { %v933_v40 = vpop.f32.mrf.mxu1 }
 0x20f   :  { %v692_v41 = vadd.f32 %v933_v40, %v1464_v49 }
 0x210   :  { %v686_v42 = vpop.f32.mrf.mxu1 }
 0x211   :  { %v774_v43 = vmax.f32 %v692_v41, 0.0  ;;  %v687_v44 = vadd.f32 %v1464_v49, %v686_v42 }
 0x213   :  { %806 = vst [vmem:[%s1598_s4 + $0x98] sm:$0xff] %v774_v43  ;;  %v773_v45 = vmax.f32 %v687_v44, 0.0 }
 0x215   :  { %805 = vst [vmem:[%s1598_s4 + $0x90] sm:$0xff] %v773_v45 }
 0x216   :  { %v936_v46 = vpop.f32.mrf.mxu1 }
 0x217   :  { %v702_v47 = vadd.f32 %v936_v46, %v1464_v49 }
 0x218   :  { %v696_v48 = vpop.f32.mrf.mxu1 }
 0x219   :  { %v776_v50 = vmax.f32 %v702_v47, 0.0  ;;  %v697_v51 = vadd.f32 %v1464_v49, %v696_v48 }
 0x21b   :  { %808 = vst [vmem:[%s1598_s4 + $0xa8] sm:$0xff] %v776_v50  ;;  %v775_v52 = vmax.f32 %v697_v51, 0.0 }
 0x21d   :  { %807 = vst [vmem:[%s1598_s4 + $0xa0] sm:$0xff] %v775_v52 }
 0x21e   :  { %v939_v53 = vpop.f32.mrf.mxu1 }
 0x21f   :  { %v712_v54 = vadd.f32 %v939_v53, %v1464_v49 }
 0x220   :  { %v706_v55 = vpop.f32.mrf.mxu1 }
 0x221   :  { %v778_v56 = vmax.f32 %v712_v54, 0.0  ;;  %v707_v57 = vadd.f32 %v1464_v49, %v706_v55 }
 0x222   :  { %v942_v58 = vpop.f32.mrf.mxu1 }
 0x223   :  { %810 = vst [vmem:[%s1598_s4 + $0xb8] sm:$0xff] %v778_v56  ;;  %v777_v59 = vmax.f32 %v707_v57, 0.0  ;;  %v722_v60 = vadd.f32 %v942_v58, %v1464_v49 }
 0x224   :  { %v716_v61 = vpop.f32.mrf.mxu1 }
 0x225   :  { %809 = vst [vmem:[%s1598_s4 + $0xb0] sm:$0xff] %v777_v59  ;;  %v780_v62 = vmax.f32 %v722_v60, 0.0  ;;  %v717_v63 = vadd.f32 %v1464_v49, %v716_v61 }
 0x226   :  { %v945_v0 = vpop.f32.mrf.mxu1 }
 0x227   :  { %812 = vst [vmem:[%s1598_s4 + $0xc8] sm:$0xff] %v780_v62  ;;  %v779_v1 = vmax.f32 %v717_v63, 0.0  ;;  %v732_v2 = vadd.f32 %v945_v0, %v1464_v49 }
 0x228   :  { %v726_v3 = vpop.f32.mrf.mxu1 }
 0x229   :  { %811 = vst [vmem:[%s1598_s4 + $0xc0] sm:$0xff] %v779_v1  ;;  %v782_v4 = vmax.f32 %v732_v2, 0.0  ;;  %v727_v5 = vadd.f32 %v1464_v49, %v726_v3 }
 0x22a   :  { %v948_v6 = vpop.f32.mrf.mxu1 }
 0x22b   :  { %814 = vst [vmem:[%s1598_s4 + $0xd8] sm:$0xff] %v782_v4  ;;  %v781_v7 = vmax.f32 %v727_v5, 0.0  ;;  %v742_v8 = vadd.f32 %v948_v6, %v1464_v49 }
 0x22c   :  { %v736_v9 = vpop.f32.mrf.mxu1 }
 0x22d   :  { %813 = vst [vmem:[%s1598_s4 + $0xd0] sm:$0xff] %v781_v7  ;;  %v784_v10 = vmax.f32 %v742_v8, 0.0  ;;  %v737_v11 = vadd.f32 %v1464_v49, %v736_v9 }
 0x22e   :  { %v951_v12 = vpop.f32.mrf.mxu1 }
 0x22f   :  { %816 = vst [vmem:[%s1598_s4 + $0xe8] sm:$0xff] %v784_v10  ;;  %v783_v13 = vmax.f32 %v737_v11, 0.0  ;;  %v752_v14 = vadd.f32 %v951_v12, %v1464_v49 }
 0x230   :  { %v746_v15 = vpop.f32.mrf.mxu1 }
 0x231   :  { %815 = vst [vmem:[%s1598_s4 + $0xe0] sm:$0xff] %v783_v13  ;;  %v786_v16 = vmax.f32 %v752_v14, 0.0  ;;  %v747_v17 = vadd.f32 %v1464_v49, %v746_v15 }
 0x233   :  { %818 = vst [vmem:[%s1598_s4 + $0xf8] sm:$0xff] %v786_v16  ;;  %v785_v18 = vmax.f32 %v747_v17, 0.0 }
 0x235   :  { %817 = vst [vmem:[%s1598_s4 + $0xf0] sm:$0xff] %v785_v18 }

</bundles_post_ra>
